<compile_context>
chip_gen: v7x
topology: tpu7x:2x2x1
jax: 0.10.0
libtpu: 0.0.40
codegen_flags: <defaults>
</compile_context>

<pallas_src>
import math
from functools import partial

import jax
import jax.numpy as jnp
from jax import lax
from jax.experimental import pallas as pl
from jax.experimental.pallas import tpu as pltpu


# --------------------------------------------------------------------------
# Tile-size helpers
# --------------------------------------------------------------------------
def _row_tile(n, pref=256):
    """Largest multiple-of-8 row tile <= pref that divides n into >=2 blocks
    (gives every kernel a 'parallel' grid dim for megacore / 2-TC chips); else n."""
    if n % 8 != 0:
        return n
    t = min(pref, n)
    t -= t % 8
    while t >= 8:
        if n % t == 0 and n // t >= 2:
            return t
        t -= 8
    return n


def _col_tile(d, pref=512):
    """Column tile: full dim when small/unaligned, else a multiple of 128 <= pref."""
    if d <= pref or d % 128 != 0:
        return d
    t = pref - pref % 128
    while t >= 128:
        if d % t == 0:
            return t
        t -= 128
    return d


# --------------------------------------------------------------------------
# Probe: can we single-buffer grid-invariant operands with pl.Buffered(1)?
# (Runs one tiny eager kernel at import; falls back to default double-buffering.)
# --------------------------------------------------------------------------
def _probe_buffered1():
    try:
        def _k(x_ref, o_ref):
            o_ref[...] = x_ref[...] + 1.0

        out = pl.pallas_call(
            _k,
            out_shape=jax.ShapeDtypeStruct((16, 128), jnp.float32),
            grid=(2,),
            in_specs=[pl.BlockSpec((8, 128), lambda i: (0, 0),
                                   pipeline_mode=pl.Buffered(1))],
            out_specs=pl.BlockSpec((8, 128), lambda i: (i, 0)),
        )(jnp.ones((8, 128), jnp.float32))
        jax.block_until_ready(out)
        return True
    except Exception:
        return False


_SINGLE_BUFFER_WEIGHTS = _probe_buffered1()


def _const_spec(shape):
    """BlockSpec for a grid-invariant operand (index_map always block 0);
    single-buffered when supported so invariant weights don't double their VMEM."""
    idx = lambda *_: (0,) * len(shape)
    if _SINGLE_BUFFER_WEIGHTS:
        return pl.BlockSpec(shape, idx, pipeline_mode=pl.Buffered(1))
    return pl.BlockSpec(shape, idx)


_VMEM_BUDGET = 48 * 1024 * 1024   # safe on v7x (64 MiB physical), generous elsewhere


# --------------------------------------------------------------------------
# Fused attention block kernel:
#   LN(x_q + Wo(MHA(Wq x_q, Wk x_kv, Wv x_kv, mask)))   per (batch, q-tile).
# --------------------------------------------------------------------------
def _attn_block_kernel(xq_ref, xkv_ref, mask_ref, wq_ref, bq_ref, wkv_ref, bkv_ref,
                       wo_ref, bo_ref, g_ref, beta_ref, o_ref,
                       *, num_heads, scale, eps):
    xq_b = xq_ref[...]                    # (tq, D) bf16  (batch dim squeezed)
    xkv_b = xkv_ref[...]                  # (Sk, D) bf16
    D = xq_b.shape[-1]
    dk = D // num_heads

    # Mask -> additive bias, computed ONCE per block (not per head).  Mask rows/
    # batch may be broadcast dims (shape (1,Sk) or (tq,Sk)); jnp broadcasting
    # handles it against the (tq, Sk) score tile.
    bias = jnp.where(mask_ref[...] == 0.0, -1e9, 0.0)

    # Fused projections (bf16 MXU inputs, f32 accumulation, f32 bias epilogue).
    q = jnp.dot(xq_b, wq_ref[...], preferred_element_type=jnp.float32) + bq_ref[...]
    kv = jnp.dot(xkv_b, wkv_ref[...], preferred_element_type=jnp.float32) + bkv_ref[...]
    k = kv[:, :D]
    v = kv[:, D:]

    # Fold the 1/sqrt(dk) scale into q (in f32, before the bf16 cast).
    q_b = (q * scale).astype(jnp.bfloat16)
    k_b = k.astype(jnp.bfloat16)          # NOT transposed: dot_general contracts last dims
    v_b = v.astype(jnp.bfloat16)

    # TODO(synk): for long Sk switch to flash-style KV-tiled online softmax, and for
    # dk < 128 batch heads with a single 'hqd,hkd->hqk' einsum instead of this loop.
    ctx_parts = []
    for h in range(num_heads):            # static unrolled; heads packed along lanes
        sl = slice(h * dk, (h + 1) * dk)
        s = lax.dot_general(q_b[:, sl], k_b[:, sl],
                            dimension_numbers=(((1,), (1,)), ((), ())),
                            preferred_element_type=jnp.float32) + bias   # (tq, Sk) f32
        m = jnp.max(s, axis=-1, keepdims=True)
        e = jnp.exp(s - m)
        prob = e * pl.reciprocal(jnp.sum(e, axis=-1, keepdims=True), approx=True)
        ctx_parts.append(jnp.dot(prob.astype(jnp.bfloat16), v_b[:, sl],
                                 preferred_element_type=jnp.float32).astype(jnp.bfloat16))

    # Single full-width output projection (K = D contraction) AFTER the head loop.
    ctx_b = jnp.concatenate(ctx_parts, axis=-1) if num_heads > 1 else ctx_parts[0]
    out = jnp.dot(ctx_b, wo_ref[...], preferred_element_type=jnp.float32) + bo_ref[...]

    # residual + LayerNorm epilogue (f32), cast to bf16 on store
    y = xq_b.astype(jnp.float32) + out
    mean = jnp.mean(y, axis=-1, keepdims=True)
    var = jnp.mean((y - mean) ** 2, axis=-1, keepdims=True)
    o_ref[...] = ((y - mean) * lax.rsqrt(var + eps) * g_ref[...]
                  + beta_ref[...]).astype(o_ref.dtype)


def attention_block(x_q, x_kv, mask, p, gamma, beta, num_heads, eps=1e-5):
    """x_q: (B,Sq,D) bf16, x_kv: (B,Sk,D) bf16,
       mask: (Bm,Qm,Sk) float 1/0 with Bm in {1,B}, Qm in {1,Sq} (broadcast in-kernel).
       returns LN(x_q + MHA(...)) : (B,Sq,D) bf16."""
    B, Sq, D = x_q.shape
    Sk = x_kv.shape[1]
    Bm, Qm, _ = mask.shape
    scale = 1.0 / math.sqrt(D // num_heads)

    tq = _row_tile(Sq, 256)
    nq = Sq // tq
    mask_q_blk = tq if Qm == Sq else 1

    def mask_idx(b, qi):
        return (b if Bm == B else 0, qi if Qm == Sq else 0, 0)

    kernel = partial(_attn_block_kernel, num_heads=num_heads, scale=scale, eps=eps)
    return pl.pallas_call(
        kernel,
        out_shape=jax.ShapeDtypeStruct((B, Sq, D), jnp.bfloat16),
        grid=(B, nq),
        in_specs=[
            pl.BlockSpec((pl.Squeezed(), tq, D), lambda b, qi: (b, qi, 0)),        # x_q
            pl.BlockSpec((pl.Squeezed(), Sk, D), lambda b, qi: (b, 0, 0)),         # x_kv
            pl.BlockSpec((pl.Squeezed(), mask_q_blk, Sk), mask_idx),               # mask
            _const_spec((D, D)),           # wq  (bf16)
            _const_spec((1, D)),           # bq
            _const_spec((D, 2 * D)),       # wkv (bf16, K|V fused)
            _const_spec((1, 2 * D)),       # bkv
            _const_spec((D, D)),           # wo  (bf16)
            _const_spec((1, D)),           # bo
            _const_spec((1, D)),           # gamma
            _const_spec((1, D)),           # beta
        ],
        out_specs=pl.BlockSpec((pl.Squeezed(), tq, D), lambda b, qi: (b, qi, 0)),
        compiler_params=pltpu.CompilerParams(
            dimension_semantics=("parallel", "parallel"),
            vmem_limit_bytes=_VMEM_BUDGET),
    )(x_q, x_kv, mask,
      p["wq"], p["bq"].reshape(1, D),
      p["wkv"], p["bkv"].reshape(1, 2 * D),
      p["wo"], p["bo"].reshape(1, D),
      gamma.reshape(1, D), beta.reshape(1, D))


# --------------------------------------------------------------------------
# Fused FeedForward block kernel: LN(x + W2 relu(W1 x + b1) + b2),
# row-tiled ("parallel") x d_ff-tiled ("arbitrary") with an f32 accumulator.
# --------------------------------------------------------------------------
def _ffn_block_kernel(x_ref, w1_ref, b1_ref, w2_ref, b2_ref, g_ref, beta_ref,
                      o_ref, acc_ref, *, eps):
    kf = pl.program_id(1)

    @pl.when(kf == 0)
    def _():
        acc_ref[...] = jnp.zeros_like(acc_ref)

    h = jnp.dot(x_ref[...], w1_ref[...],
                preferred_element_type=jnp.float32) + b1_ref[...]          # (tm, tf) f32
    h = jnp.maximum(h, 0.0)
    acc_ref[...] += jnp.dot(h.astype(jnp.bfloat16), w2_ref[...],
                            preferred_element_type=jnp.float32)            # (tm, D) f32

    @pl.when(kf == pl.num_programs(1) - 1)
    def _():
        y = x_ref[...].astype(jnp.float32) + acc_ref[...] + b2_ref[...]    # residual
        mean = jnp.mean(y, axis=-1, keepdims=True)
        var = jnp.mean((y - mean) ** 2, axis=-1, keepdims=True)
        o_ref[...] = ((y - mean) * lax.rsqrt(var + eps) * g_ref[...]
                      + beta_ref[...]).astype(o_ref.dtype)


def ffn_block(x, p, gamma, beta, eps=1e-5):
    B, S, D = x.shape
    Fh = p["w1"].shape[1]
    n = B * S
    tm = _row_tile(n, 256)
    tf = _col_tile(Fh, 512)
    nf = Fh // tf
    x2 = x.reshape(n, D)

    if nf == 1:   # whole d_ff fits one block -> weights are grid-invariant
        w1_spec, b1_spec, w2_spec = (_const_spec((D, Fh)), _const_spec((1, Fh)),
                                     _const_spec((Fh, D)))
    else:
        w1_spec = pl.BlockSpec((D, tf), lambda i, kf: (0, kf))
        b1_spec = pl.BlockSpec((1, tf), lambda i, kf: (0, kf))
        w2_spec = pl.BlockSpec((tf, D), lambda i, kf: (kf, 0))

    y = pl.pallas_call(
        partial(_ffn_block_kernel, eps=eps),
        out_shape=jax.ShapeDtypeStruct((n, D), jnp.bfloat16),
        grid=(n // tm, nf),
        in_specs=[
            pl.BlockSpec((tm, D), lambda i, kf: (i, 0)),   # x (bf16, resident across kf)
            w1_spec, b1_spec, w2_spec,
            _const_spec((1, D)),                           # b2
            _const_spec((1, D)),                           # gamma
            _const_spec((1, D)),                           # beta
        ],
        out_specs=pl.BlockSpec((tm, D), lambda i, kf: (i, 0)),
        scratch_shapes=[pltpu.VMEM((tm, D), jnp.float32)],
        compiler_params=pltpu.CompilerParams(
            dimension_semantics=("parallel", "arbitrary"),
            vmem_limit_bytes=_VMEM_BUDGET),
    )(x2, p["w1"], p["b1"].reshape(1, Fh), p["w2"], p["b2"].reshape(1, D),
      gamma.reshape(1, D), beta.reshape(1, D))
    return y.reshape(B, S, D)


# --------------------------------------------------------------------------
# Tiled linear (vocab projection): (M, N, K) grid + f32 VMEM accumulator.
# --------------------------------------------------------------------------
def _linear_kernel(x_ref, w_ref, b_ref, o_ref, acc_ref):
    @pl.when(pl.program_id(2) == 0)
    def _():
        acc_ref[...] = jnp.zeros_like(acc_ref)

    acc_ref[...] += jnp.dot(x_ref[...], w_ref[...],
                            preferred_element_type=jnp.float32)

    @pl.when(pl.program_id(2) == pl.num_programs(2) - 1)
    def _():
        o_ref[...] = acc_ref[...] + b_ref[...]


def linear(x2d, w, b, *, tm_pref=256, tn_pref=512, tk_pref=512):
    """x2d: (N, Din) (cast to bf16 here), w: (Din, Dout) bf16, b: (Dout,) f32
       -> (N, Dout) f32 logits."""
    x2d = x2d.astype(jnp.bfloat16)         # half the re-streamed x bytes per N-tile
    n, din = x2d.shape
    dout = w.shape[1]
    tm = _row_tile(n, tm_pref)
    tn = _col_tile(dout, tn_pref)
    tk = _col_tile(din, tk_pref)
    grid = (n // tm, dout // tn, din // tk)
    return pl.pallas_call(
        _linear_kernel,
        out_shape=jax.ShapeDtypeStruct((n, dout), jnp.float32),
        grid=grid,
        in_specs=[
            pl.BlockSpec((tm, tk), lambda i, j, k: (i, k)),
            pl.BlockSpec((tk, tn), lambda i, j, k: (k, j)),
            pl.BlockSpec((1, tn), lambda i, j, k: (0, j)),
        ],
        out_specs=pl.BlockSpec((tm, tn), lambda i, j, k: (i, j)),
        scratch_shapes=[pltpu.VMEM((tm, tn), jnp.float32)],
        compiler_params=pltpu.CompilerParams(
            dimension_semantics=("parallel", "parallel", "arbitrary"),
            vmem_limit_bytes=_VMEM_BUDGET),
    )(x2d, w, b.reshape(1, dout))


# --------------------------------------------------------------------------
# Model composition (embedding gather / positional encoding are JAX glue)
# --------------------------------------------------------------------------
def positional_encoding(max_len, d_model):
    pos = jnp.arange(max_len, dtype=jnp.float32)[:, None]
    div = jnp.exp(jnp.arange(0, d_model, 2, dtype=jnp.float32)
                  * (-math.log(10000.0) / d_model))
    pe = jnp.zeros((max_len, d_model), jnp.float32)
    pe = pe.at[:, 0::2].set(jnp.sin(pos * div))
    pe = pe.at[:, 1::2].set(jnp.cos(pos * div))
    return pe


def embed(emb_table, tokens, pe, d_model):
    # Embedding gather + scale + positional encoding (glue; not a hot path).
    x = emb_table[tokens] * math.sqrt(d_model)
    x = x + pe[: tokens.shape[1]][None, :, :]
    return x.astype(jnp.bfloat16)          # inter-kernel activations kept in bf16


def transformer_forward(params, src, tgt, src_pad_mask, tgt_causal_mask, cfg):
    """src/tgt: int32 token ids (B,Ss)/(B,St).
       src_pad_mask: (B, Ss) float 1/0;  tgt_causal_mask: (St, St) float 1/0."""
    H = cfg["num_heads"]
    D = cfg["d_model"]
    B, Ss = src.shape
    St = tgt.shape[1]

    # Masks are NOT materialized/broadcast in HBM; kernels broadcast in-vregs.
    pad_mask = src_pad_mask[:, None, :]            # (B, 1, Ss)
    causal_mask = tgt_causal_mask[None, :, :]      # (1, St, St)

    # --- encoder ---
    x = embed(params["enc_emb"], src, params["pe"], D)
    for lp in params["enc_layers"]:
        x = attention_block(x, x, pad_mask, lp["self_attn"],
                            lp["norm1_g"], lp["norm1_b"], H)
        x = ffn_block(x, lp["ff"], lp["norm2_g"], lp["norm2_b"])
    enc_out = x

    # --- decoder ---
    y = embed(params["dec_emb"], tgt, params["pe"], D)
    for lp in params["dec_layers"]:
        y = attention_block(y, y, causal_mask, lp["self_attn"],
                            lp["norm1_g"], lp["norm1_b"], H)
        y = attention_block(y, enc_out, pad_mask, lp["cross_attn"],
                            lp["norm2_g"], lp["norm2_b"], H)
        y = ffn_block(y, lp["ff"], lp["norm3_g"], lp["norm3_b"])

    # --- output projection (tiled matmul kernel) ---
    logits = linear(y.reshape(B * St, D), params["out"]["w"], params["out"]["b"])
    return logits.reshape(B, St, -1)


# --------------------------------------------------------------------------
# Deterministic parameter init (synthetic; shapes follow the PyTorch module)
# --------------------------------------------------------------------------
def init_linear(key, din, dout):
    w = (jax.random.normal(key, (din, dout), jnp.float32) * 0.02).astype(jnp.bfloat16)
    b = jnp.zeros((dout,), jnp.float32)
    return {"w": w, "b": b}


def init_mha(key, d_model):
    kq, kk, kv, ko = jax.random.split(key, 4)
    wq = init_linear(kq, d_model, d_model)
    wk = init_linear(kk, d_model, d_model)
    wv = init_linear(kv, d_model, d_model)
    wo = init_linear(ko, d_model, d_model)
    return {"wq": wq["w"], "bq": wq["b"],
            "wkv": jnp.concatenate([wk["w"], wv["w"]], axis=1),   # fused K|V projection
            "bkv": jnp.concatenate([wk["b"], wv["b"]]),
            "wo": wo["w"], "bo": wo["b"]}


def init_ffn(key, d_model, d_ff):
    k1, k2 = jax.random.split(key)
    l1 = init_linear(k1, d_model, d_ff)
    l2 = init_linear(k2, d_ff, d_model)
    return {"w1": l1["w"], "b1": l1["b"], "w2": l2["w"], "b2": l2["b"]}


def init_enc_layer(key, d_model, d_ff):
    k1, k2 = jax.random.split(key)
    return {"self_attn": init_mha(k1, d_model),
            "ff": init_ffn(k2, d_model, d_ff),
            "norm1_g": jnp.ones((d_model,), jnp.float32),
            "norm1_b": jnp.zeros((d_model,), jnp.float32),
            "norm2_g": jnp.ones((d_model,), jnp.float32),
            "norm2_b": jnp.zeros((d_model,), jnp.float32)}


def init_dec_layer(key, d_model, d_ff):
    k1, k2, k3 = jax.random.split(key, 3)
    return {"self_attn": init_mha(k1, d_model),
            "cross_attn": init_mha(k2, d_model),
            "ff": init_ffn(k3, d_model, d_ff),
            "norm1_g": jnp.ones((d_model,), jnp.float32),
            "norm1_b": jnp.zeros((d_model,), jnp.float32),
            "norm2_g": jnp.ones((d_model,), jnp.float32),
            "norm2_b": jnp.zeros((d_model,), jnp.float32),
            "norm3_g": jnp.ones((d_model,), jnp.float32),
            "norm3_b": jnp.zeros((d_model,), jnp.float32)}


def init_transformer(key, cfg):
    D, Fh, L = cfg["d_model"], cfg["d_ff"], cfg["num_layers"]
    keys = jax.random.split(key, 3 + 2 * L)
    params = {
        "enc_emb": jax.random.normal(keys[0], (cfg["src_vocab"], D), jnp.float32) * 0.02,
        "dec_emb": jax.random.normal(keys[1], (cfg["tgt_vocab"], D), jnp.float32) * 0.02,
        "pe": positional_encoding(cfg["max_seq_len"], D),
        "enc_layers": [init_enc_layer(keys[2 + i], D, Fh) for i in range(L)],
        "dec_layers": [init_dec_layer(keys[2 + L + i], D, Fh) for i in range(L)],
        "out": init_linear(keys[2 + 2 * L], D, cfg["tgt_vocab"]),
    }
    return params


# --------------------------------------------------------------------------
if __name__ == "__main__":
    cfg = dict(src_vocab=16, tgt_vocab=16, d_model=32, num_layers=2,
               num_heads=4, d_ff=64, max_seq_len=64)
    B, Ss, St = 2, 8, 8

    key = jax.random.PRNGKey(0)
    kp, ks, kt = jax.random.split(key, 3)
    params = init_transformer(kp, cfg)

    src = jax.random.randint(ks, (B, Ss), 0, cfg["src_vocab"], dtype=jnp.int32)
    tgt = jax.random.randint(kt, (B, St), 0, cfg["tgt_vocab"], dtype=jnp.int32)
    src_pad_mask = jnp.ones((B, Ss), jnp.float32)                       # 1 = attend
    tgt_causal_mask = jnp.tril(jnp.ones((St, St), jnp.float32))         # lower-tri

    fwd = jax.jit(partial(transformer_forward, cfg=cfg))
    logits = fwd(params, src, tgt, src_pad_mask, tgt_causal_mask)
    jax.block_until_ready(logits)

    assert logits.shape == (B, St, cfg["tgt_vocab"])
    assert bool(jnp.all(jnp.isfinite(logits)))
    print("KERNEL_OK")
</pallas_src>

<mosaic_0001>
module attributes {stable_mosaic.version = 11 : i64} {
  func.func @_k(%arg0: i32, %arg1: memref<8x128xf32, #tpu.memory_space<vmem>>, %arg2: memref<8x128xf32, #tpu.memory_space<vmem>>) attributes {dimension_semantics = [#tpu.dimension_semantics<arbitrary>], iteration_bounds = array<i64: 2>, scalar_prefetch = 0 : i64, scratch_operands = 0 : i64, tpu.core_type = #tpu.core_type<tc>, window_params = [{pipeline_mode = #tpu.pipeline_mode<synchronous>, transform_indices = @transform_0, window_bounds = array<i64: 8, 128>}, {transform_indices = @transform_1, window_bounds = array<i64: 8, 128>}]} {
    %c0 = arith.constant 0 : index
    %c0_0 = arith.constant 0 : index
    %0 = vector.load %arg1[%c0, %c0_0] : memref<8x128xf32, #tpu.memory_space<vmem>>, vector<8x128xf32>
    %cst = arith.constant 1.000000e+00 : f32
    %1 = vector.broadcast %cst : f32 to vector<8x128xf32>
    %2 = arith.addf %0, %1 : vector<8x128xf32>
    %c0_1 = arith.constant 0 : index
    %c0_2 = arith.constant 0 : index
    %3 = vector.load %arg2[%c0_1, %c0_2] : memref<8x128xf32, #tpu.memory_space<vmem>>, vector<8x128xf32>
    tpu.vector_store %arg2[%c0_1, %c0_2], %2 {strides = array<i32>} : memref<8x128xf32, #tpu.memory_space<vmem>>, vector<8x128xf32>,
    return
  }
  func.func @transform_0(%arg0: i32) -> (i32, i32) {
    %c0_i32 = arith.constant 0 : i32
    %c0_i32_0 = arith.constant 0 : i32
    %c0_i32_1 = arith.constant 0 : i32
    return %c0_i32, %c0_i32_0 : i32, i32
  }
  func.func @transform_1(%arg0: i32) -> (i32, i32) {
    %c0_i32 = arith.constant 0 : i32
    %c0_i32_0 = arith.constant 0 : i32
    return %arg0, %c0_i32 : i32, i32
  }
}

module attributes {stable_mosaic.version = 11 : i64} {
  func.func @_attn_block_kernel(%arg0: i32, %arg1: i32, %arg2: memref<1x8x32xbf16, #tpu.memory_space<vmem>>, %arg3: memref<1x8x32xbf16, #tpu.memory_space<vmem>>, %arg4: memref<1x1x8xf32, #tpu.memory_space<vmem>>, %arg5: memref<32x32xbf16, #tpu.memory_space<vmem>>, %arg6: memref<1x32xf32, #tpu.memory_space<vmem>>, %arg7: memref<32x64xbf16, #tpu.memory_space<vmem>>, %arg8: memref<1x64xf32, #tpu.memory_space<vmem>>, %arg9: memref<32x32xbf16, #tpu.memory_space<vmem>>, %arg10: memref<1x32xf32, #tpu.memory_space<vmem>>, %arg11: memref<1x32xf32, #tpu.memory_space<vmem>>, %arg12: memref<1x32xf32, #tpu.memory_space<vmem>>, %arg13: memref<1x8x32xbf16, #tpu.memory_space<vmem>>) attributes {dimension_semantics = [#tpu.dimension_semantics<parallel>, #tpu.dimension_semantics<parallel>], iteration_bounds = array<i64: 2, 1>, scalar_prefetch = 0 : i64, scratch_operands = 0 : i64, tpu.core_type = #tpu.core_type<tc>, window_params = [{transform_indices = @transform_0, window_bounds = array<i64: 1, 8, 32>}, {transform_indices = @transform_1, window_bounds = array<i64: 1, 8, 32>}, {transform_indices = @transform_2, window_bounds = array<i64: 1, 1, 8>}, {pipeline_mode = #tpu.pipeline_mode<synchronous>, transform_indices = @transform_3, window_bounds = array<i64: 32, 32>}, {pipeline_mode = #tpu.pipeline_mode<synchronous>, transform_indices = @transform_4, window_bounds = array<i64: 1, 32>}, {pipeline_mode = #tpu.pipeline_mode<synchronous>, transform_indices = @transform_5, window_bounds = array<i64: 32, 64>}, {pipeline_mode = #tpu.pipeline_mode<synchronous>, transform_indices = @transform_6, window_bounds = array<i64: 1, 64>}, {pipeline_mode = #tpu.pipeline_mode<synchronous>, transform_indices = @transform_7, window_bounds = array<i64: 32, 32>}, {pipeline_mode = #tpu.pipeline_mode<synchronous>, transform_indices = @transform_8, window_bounds = array<i64: 1, 32>}, {pipeline_mode = #tpu.pipeline_mode<synchronous>, transform_indices = @transform_9, window_bounds = array<i64: 1, 32>}, {pipeline_mode = #tpu.pipeline_mode<synchronous>, transform_indices = @transform_10, window_bounds = array<i64: 1, 32>}, {transform_indices = @transform_11, window_bounds = array<i64: 1, 8, 32>}]} {
    %c0 = arith.constant 0 : index
    %c0_0 = arith.constant 0 : index
    %c0_1 = arith.constant 0 : index
    %0 = vector.load %arg2[%c0, %c0_0, %c0_1] : memref<1x8x32xbf16, #tpu.memory_space<vmem>>, vector<1x8x32xbf16>
    %1 = vector.shape_cast %0 : vector<1x8x32xbf16> to vector<8x32xbf16>
    %c0_2 = arith.constant 0 : index
    %c0_3 = arith.constant 0 : index
    %c0_4 = arith.constant 0 : index
    %2 = vector.load %arg3[%c0_2, %c0_3, %c0_4] : memref<1x8x32xbf16, #tpu.memory_space<vmem>>, vector<1x8x32xbf16>
    %3 = vector.shape_cast %2 : vector<1x8x32xbf16> to vector<8x32xbf16>
    %c0_5 = arith.constant 0 : index
    %c0_6 = arith.constant 0 : index
    %c0_7 = arith.constant 0 : index
    %4 = vector.load %arg4[%c0_5, %c0_6, %c0_7] : memref<1x1x8xf32, #tpu.memory_space<vmem>>, vector<1x1x8xf32>
    %5 = vector.shape_cast %4 : vector<1x1x8xf32> to vector<1x8xf32>
    %cst = arith.constant 0.000000e+00 : f32
    %6 = vector.broadcast %cst : f32 to vector<1x8xf32>
    %7 = arith.cmpf oeq, %5, %6 : vector<1x8xf32>
    %cst_8 = arith.constant -1.000000e+09 : f32
    %cst_9 = arith.constant 0.000000e+00 : f32
    %8 = vector.broadcast %cst_8 : f32 to vector<1x8xf32>
    %9 = vector.broadcast %cst_9 : f32 to vector<1x8xf32>
    %10 = arith.select %7, %8, %9 : vector<1x8xi1>, vector<1x8xf32>
    %c0_10 = arith.constant 0 : index
    %c0_11 = arith.constant 0 : index
    %11 = vector.load %arg5[%c0_10, %c0_11] : memref<32x32xbf16, #tpu.memory_space<vmem>>, vector<32x32xbf16>
    %cst_12 = arith.constant dense<0.000000e+00> : vector<8x32xf32>
    %12 = tpu.matmul %1, %11, %cst_12 {dimension_numbers = #tpu.dot_dimension_numbers<[1], [0], [0], [1], [0, 0, 1, 1], [], []>} : vector<8x32xbf16>, vector<32x32xbf16>, vector<8x32xf32> -> vector<8x32xf32>
    %c0_13 = arith.constant 0 : index
    %c0_14 = arith.constant 0 : index
    %13 = vector.load %arg6[%c0_13, %c0_14] : memref<1x32xf32, #tpu.memory_space<vmem>>, vector<1x32xf32>
    %14 = vector.broadcast %13 : vector<1x32xf32> to vector<8x32xf32>
    %15 = arith.addf %12, %14 : vector<8x32xf32>
    %c0_15 = arith.constant 0 : index
    %c0_16 = arith.constant 0 : index
    %16 = vector.load %arg7[%c0_15, %c0_16] : memref<32x64xbf16, #tpu.memory_space<vmem>>, vector<32x64xbf16>
    %cst_17 = arith.constant dense<0.000000e+00> : vector<8x64xf32>
    %17 = tpu.matmul %3, %16, %cst_17 {dimension_numbers = #tpu.dot_dimension_numbers<[1], [0], [0], [1], [0, 0, 1, 1], [], []>} : vector<8x32xbf16>, vector<32x64xbf16>, vector<8x64xf32> -> vector<8x64xf32>
    %c0_18 = arith.constant 0 : index
    %c0_19 = arith.constant 0 : index
    %18 = vector.load %arg8[%c0_18, %c0_19] : memref<1x64xf32, #tpu.memory_space<vmem>>, vector<1x64xf32>
    %19 = vector.broadcast %18 : vector<1x64xf32> to vector<8x64xf32>
    %20 = arith.addf %17, %19 : vector<8x64xf32>
    %21 = vector.extract_strided_slice %20 {offsets = [0, 0], sizes = [8, 32], strides = [1, 1]} : vector<8x64xf32> to vector<8x32xf32>
    %22 = vector.extract_strided_slice %20 {offsets = [0, 32], sizes = [8, 32], strides = [1, 1]} : vector<8x64xf32> to vector<8x32xf32>
    %cst_20 = arith.constant 0.353553385 : f32
    %23 = vector.broadcast %cst_20 : f32 to vector<8x32xf32>
    %24 = arith.mulf %15, %23 : vector<8x32xf32>
    %25 = arith.truncf %24 : vector<8x32xf32> to vector<8x32xbf16>
    %26 = arith.truncf %21 : vector<8x32xf32> to vector<8x32xbf16>
    %27 = arith.truncf %22 : vector<8x32xf32> to vector<8x32xbf16>
    %28 = vector.extract_strided_slice %25 {offsets = [0, 0], sizes = [8, 8], strides = [1, 1]} : vector<8x32xbf16> to vector<8x8xbf16>
    %29 = vector.extract_strided_slice %26 {offsets = [0, 0], sizes = [8, 8], strides = [1, 1]} : vector<8x32xbf16> to vector<8x8xbf16>
    %cst_21 = arith.constant dense<0.000000e+00> : vector<8x8xf32>
    %30 = tpu.matmul %28, %29, %cst_21 {dimension_numbers = #tpu.dot_dimension_numbers<[1], [1], [0], [0], [0, 0, 1, 0], [], []>} : vector<8x8xbf16>, vector<8x8xbf16>, vector<8x8xf32> -> vector<8x8xf32>
    %31 = vector.broadcast %10 : vector<1x8xf32> to vector<8x8xf32>
    %32 = arith.addf %30, %31 : vector<8x8xf32>
    %cst_22 = arith.constant dense<0xFF800000> : vector<8xf32>
    %33 = vector.multi_reduction <maximumf>, %32, %cst_22 [1] : vector<8x8xf32> to vector<8xf32>
    %34 = vector.shape_cast %33 : vector<8xf32> to vector<8x1xf32>
    %35 = vector.broadcast %34 : vector<8x1xf32> to vector<8x8xf32>
    %36 = arith.subf %32, %35 : vector<8x8xf32>
    %37 = math.exp %36 : vector<8x8xf32>
    %cst_23 = arith.constant dense<0.000000e+00> : vector<8xf32>
    %38 = vector.multi_reduction <add>, %37, %cst_23 [1] : vector<8x8xf32> to vector<8xf32>
    %39 = vector.shape_cast %38 : vector<8xf32> to vector<8x1xf32>
    %40 = tpu.reciprocal %39 {approx = true} : vector<8x1xf32> -> vector<8x1xf32>
    %41 = vector.broadcast %40 : vector<8x1xf32> to vector<8x8xf32>
    %42 = arith.mulf %37, %41 : vector<8x8xf32>
    %43 = arith.truncf %42 : vector<8x8xf32> to vector<8x8xbf16>
    %44 = vector.extract_strided_slice %27 {offsets = [0, 0], sizes = [8, 8], strides = [1, 1]} : vector<8x32xbf16> to vector<8x8xbf16>
    %cst_24 = arith.constant dense<0.000000e+00> : vector<8x8xf32>
    %45 = tpu.matmul %43, %44, %cst_24 {dimension_numbers = #tpu.dot_dimension_numbers<[1], [0], [0], [1], [0, 0, 1, 1], [], []>} : vector<8x8xbf16>, vector<8x8xbf16>, vector<8x8xf32> -> vector<8x8xf32>
    %46 = arith.truncf %45 : vector<8x8xf32> to vector<8x8xbf16>
    %47 = vector.extract_strided_slice %25 {offsets = [0, 8], sizes = [8, 8], strides = [1, 1]} : vector<8x32xbf16> to vector<8x8xbf16>
    %48 = vector.extract_strided_slice %26 {offsets = [0, 8], sizes = [8, 8], strides = [1, 1]} : vector<8x32xbf16> to vector<8x8xbf16>
    %cst_25 = arith.constant dense<0.000000e+00> : vector<8x8xf32>
    %49 = tpu.matmul %47, %48, %cst_25 {dimension_numbers = #tpu.dot_dimension_numbers<[1], [1], [0], [0], [0, 0, 1, 0], [], []>} : vector<8x8xbf16>, vector<8x8xbf16>, vector<8x8xf32> -> vector<8x8xf32>
    %50 = vector.broadcast %10 : vector<1x8xf32> to vector<8x8xf32>
    %51 = arith.addf %49, %50 : vector<8x8xf32>
    %cst_26 = arith.constant dense<0xFF800000> : vector<8xf32>
    %52 = vector.multi_reduction <maximumf>, %51, %cst_26 [1] : vector<8x8xf32> to vector<8xf32>
    %53 = vector.shape_cast %52 : vector<8xf32> to vector<8x1xf32>
    %54 = vector.broadcast %53 : vector<8x1xf32> to vector<8x8xf32>
    %55 = arith.subf %51, %54 : vector<8x8xf32>
    %56 = math.exp %55 : vector<8x8xf32>
    %cst_27 = arith.constant dense<0.000000e+00> : vector<8xf32>
    %57 = vector.multi_reduction <add>, %56, %cst_27 [1] : vector<8x8xf32> to vector<8xf32>
    %58 = vector.shape_cast %57 : vector<8xf32> to vector<8x1xf32>
    %59 = tpu.reciprocal %58 {approx = true} : vector<8x1xf32> -> vector<8x1xf32>
    %60 = vector.broadcast %59 : vector<8x1xf32> to vector<8x8xf32>
    %61 = arith.mulf %56, %60 : vector<8x8xf32>
    %62 = arith.truncf %61 : vector<8x8xf32> to vector<8x8xbf16>
    %63 = vector.extract_strided_slice %27 {offsets = [0, 8], sizes = [8, 8], strides = [1, 1]} : vector<8x32xbf16> to vector<8x8xbf16>
    %cst_28 = arith.constant dense<0.000000e+00> : vector<8x8xf32>
    %64 = tpu.matmul %62, %63, %cst_28 {dimension_numbers = #tpu.dot_dimension_numbers<[1], [0], [0], [1], [0, 0, 1, 1], [], []>} : vector<8x8xbf16>, vector<8x8xbf16>, vector<8x8xf32> -> vector<8x8xf32>
    %65 = arith.truncf %64 : vector<8x8xf32> to vector<8x8xbf16>
    %66 = vector.extract_strided_slice %25 {offsets = [0, 16], sizes = [8, 8], strides = [1, 1]} : vector<8x32xbf16> to vector<8x8xbf16>
    %67 = vector.extract_strided_slice %26 {offsets = [0, 16], sizes = [8, 8], strides = [1, 1]} : vector<8x32xbf16> to vector<8x8xbf16>
    %cst_29 = arith.constant dense<0.000000e+00> : vector<8x8xf32>
    %68 = tpu.matmul %66, %67, %cst_29 {dimension_numbers = #tpu.dot_dimension_numbers<[1], [1], [0], [0], [0, 0, 1, 0], [], []>} : vector<8x8xbf16>, vector<8x8xbf16>, vector<8x8xf32> -> vector<8x8xf32>
    %69 = vector.broadcast %10 : vector<1x8xf32> to vector<8x8xf32>
    %70 = arith.addf %68, %69 : vector<8x8xf32>
    %cst_30 = arith.constant dense<0xFF800000> : vector<8xf32>
    %71 = vector.multi_reduction <maximumf>, %70, %cst_30 [1] : vector<8x8xf32> to vector<8xf32>
    %72 = vector.shape_cast %71 : vector<8xf32> to vector<8x1xf32>
    %73 = vector.broadcast %72 : vector<8x1xf32> to vector<8x8xf32>
    %74 = arith.subf %70, %73 : vector<8x8xf32>
    %75 = math.exp %74 : vector<8x8xf32>
    %cst_31 = arith.constant dense<0.000000e+00> : vector<8xf32>
    %76 = vector.multi_reduction <add>, %75, %cst_31 [1] : vector<8x8xf32> to vector<8xf32>
    %77 = vector.shape_cast %76 : vector<8xf32> to vector<8x1xf32>
    %78 = tpu.reciprocal %77 {approx = true} : vector<8x1xf32> -> vector<8x1xf32>
    %79 = vector.broadcast %78 : vector<8x1xf32> to vector<8x8xf32>
    %80 = arith.mulf %75, %79 : vector<8x8xf32>
    %81 = arith.truncf %80 : vector<8x8xf32> to vector<8x8xbf16>
    %82 = vector.extract_strided_slice %27 {offsets = [0, 16], sizes = [8, 8], strides = [1, 1]} : vector<8x32xbf16> to vector<8x8xbf16>
    %cst_32 = arith.constant dense<0.000000e+00> : vector<8x8xf32>
    %83 = tpu.matmul %81, %82, %cst_32 {dimension_numbers = #tpu.dot_dimension_numbers<[1], [0], [0], [1], [0, 0, 1, 1], [], []>} : vector<8x8xbf16>, vector<8x8xbf16>, vector<8x8xf32> -> vector<8x8xf32>
    %84 = arith.truncf %83 : vector<8x8xf32> to vector<8x8xbf16>
    %85 = vector.extract_strided_slice %25 {offsets = [0, 24], sizes = [8, 8], strides = [1, 1]} : vector<8x32xbf16> to vector<8x8xbf16>
    %86 = vector.extract_strided_slice %26 {offsets = [0, 24], sizes = [8, 8], strides = [1, 1]} : vector<8x32xbf16> to vector<8x8xbf16>
    %cst_33 = arith.constant dense<0.000000e+00> : vector<8x8xf32>
    %87 = tpu.matmul %85, %86, %cst_33 {dimension_numbers = #tpu.dot_dimension_numbers<[1], [1], [0], [0], [0, 0, 1, 0], [], []>} : vector<8x8xbf16>, vector<8x8xbf16>, vector<8x8xf32> -> vector<8x8xf32>
    %88 = vector.broadcast %10 : vector<1x8xf32> to vector<8x8xf32>
    %89 = arith.addf %87, %88 : vector<8x8xf32>
    %cst_34 = arith.constant dense<0xFF800000> : vector<8xf32>
    %90 = vector.multi_reduction <maximumf>, %89, %cst_34 [1] : vector<8x8xf32> to vector<8xf32>
    %91 = vector.shape_cast %90 : vector<8xf32> to vector<8x1xf32>
    %92 = vector.broadcast %91 : vector<8x1xf32> to vector<8x8xf32>
    %93 = arith.subf %89, %92 : vector<8x8xf32>
    %94 = math.exp %93 : vector<8x8xf32>
    %cst_35 = arith.constant dense<0.000000e+00> : vector<8xf32>
    %95 = vector.multi_reduction <add>, %94, %cst_35 [1] : vector<8x8xf32> to vector<8xf32>
    %96 = vector.shape_cast %95 : vector<8xf32> to vector<8x1xf32>
    %97 = tpu.reciprocal %96 {approx = true} : vector<8x1xf32> -> vector<8x1xf32>
    %98 = vector.broadcast %97 : vector<8x1xf32> to vector<8x8xf32>
    %99 = arith.mulf %94, %98 : vector<8x8xf32>
    %100 = arith.truncf %99 : vector<8x8xf32> to vector<8x8xbf16>
    %101 = vector.extract_strided_slice %27 {offsets = [0, 24], sizes = [8, 8], strides = [1, 1]} : vector<8x32xbf16> to vector<8x8xbf16>
    %cst_36 = arith.constant dense<0.000000e+00> : vector<8x8xf32>
    %102 = tpu.matmul %100, %101, %cst_36 {dimension_numbers = #tpu.dot_dimension_numbers<[1], [0], [0], [1], [0, 0, 1, 1], [], []>} : vector<8x8xbf16>, vector<8x8xbf16>, vector<8x8xf32> -> vector<8x8xf32>
    %103 = arith.truncf %102 : vector<8x8xf32> to vector<8x8xbf16>
    %104 = tpu.concatenate %46, %65, %84, %103 in 1 : vector<8x8xbf16>, vector<8x8xbf16>, vector<8x8xbf16>, vector<8x8xbf16> -> vector<8x32xbf16>
    %c0_37 = arith.constant 0 : index
    %c0_38 = arith.constant 0 : index
    %105 = vector.load %arg9[%c0_37, %c0_38] : memref<32x32xbf16, #tpu.memory_space<vmem>>, vector<32x32xbf16>
    %cst_39 = arith.constant dense<0.000000e+00> : vector<8x32xf32>
    %106 = tpu.matmul %104, %105, %cst_39 {dimension_numbers = #tpu.dot_dimension_numbers<[1], [0], [0], [1], [0, 0, 1, 1], [], []>} : vector<8x32xbf16>, vector<32x32xbf16>, vector<8x32xf32> -> vector<8x32xf32>
    %c0_40 = arith.constant 0 : index
    %c0_41 = arith.constant 0 : index
    %107 = vector.load %arg10[%c0_40, %c0_41] : memref<1x32xf32, #tpu.memory_space<vmem>>, vector<1x32xf32>
    %108 = vector.broadcast %107 : vector<1x32xf32> to vector<8x32xf32>
    %109 = arith.addf %106, %108 : vector<8x32xf32>
    %110 = arith.extf %1 : vector<8x32xbf16> to vector<8x32xf32>
    %111 = arith.addf %110, %109 : vector<8x32xf32>
    %cst_42 = arith.constant dense<0.000000e+00> : vector<8xf32>
    %112 = vector.multi_reduction <add>, %111, %cst_42 [1] : vector<8x32xf32> to vector<8xf32>
    %113 = vector.shape_cast %112 : vector<8xf32> to vector<8x1xf32>
    %cst_43 = arith.constant 3.200000e+01 : f32
    %114 = vector.broadcast %cst_43 : f32 to vector<8x1xf32>
    %115 = arith.divf %113, %114 : vector<8x1xf32>
    %116 = vector.broadcast %115 : vector<8x1xf32> to vector<8x32xf32>
    %117 = arith.subf %111, %116 : vector<8x32xf32>
    %118 = arith.mulf %117, %117 : vector<8x32xf32>
    %cst_44 = arith.constant dense<0.000000e+00> : vector<8xf32>
    %119 = vector.multi_reduction <add>, %118, %cst_44 [1] : vector<8x32xf32> to vector<8xf32>
    %120 = vector.shape_cast %119 : vector<8xf32> to vector<8x1xf32>
    %cst_45 = arith.constant 3.200000e+01 : f32
    %121 = vector.broadcast %cst_45 : f32 to vector<8x1xf32>
    %122 = arith.divf %120, %121 : vector<8x1xf32>
    %123 = vector.broadcast %115 : vector<8x1xf32> to vector<8x32xf32>
    %124 = arith.subf %111, %123 : vector<8x32xf32>
    %cst_46 = arith.constant 9.99999974E-6 : f32
    %125 = vector.broadcast %cst_46 : f32 to vector<8x1xf32>
    %126 = arith.addf %122, %125 : vector<8x1xf32>
    %127 = math.rsqrt %126 : vector<8x1xf32>
    %128 = vector.broadcast %127 : vector<8x1xf32> to vector<8x32xf32>
    %129 = arith.mulf %124, %128 : vector<8x32xf32>
    %c0_47 = arith.constant 0 : index
    %c0_48 = arith.constant 0 : index
    %130 = vector.load %arg11[%c0_47, %c0_48] : memref<1x32xf32, #tpu.memory_space<vmem>>, vector<1x32xf32>
    %131 = vector.broadcast %130 : vector<1x32xf32> to vector<8x32xf32>
    %132 = arith.mulf %129, %131 : vector<8x32xf32>
    %c0_49 = arith.constant 0 : index
    %c0_50 = arith.constant 0 : index
    %133 = vector.load %arg12[%c0_49, %c0_50] : memref<1x32xf32, #tpu.memory_space<vmem>>, vector<1x32xf32>
    %134 = vector.broadcast %133 : vector<1x32xf32> to vector<8x32xf32>
    %135 = arith.addf %132, %134 : vector<8x32xf32>
    %136 = arith.truncf %135 : vector<8x32xf32> to vector<8x32xbf16>
    %c0_51 = arith.constant 0 : index
    %c0_52 = arith.constant 0 : index
    %c0_53 = arith.constant 0 : index
    %137 = vector.load %arg13[%c0_51, %c0_52, %c0_53] : memref<1x8x32xbf16, #tpu.memory_space<vmem>>, vector<1x8x32xbf16>
    %138 = vector.shape_cast %137 : vector<1x8x32xbf16> to vector<8x32xbf16>
    %139 = vector.shape_cast %136 : vector<8x32xbf16> to vector<1x8x32xbf16>
    tpu.vector_store %arg13[%c0_51, %c0_52, %c0_53], %139 {strides = array<i32>} : memref<1x8x32xbf16, #tpu.memory_space<vmem>>, vector<1x8x32xbf16>,
    return
  }
  func.func @transform_0(%arg0: i32, %arg1: i32) -> (i32, i32, i32) {
    %c0_i32 = arith.constant 0 : i32
    %c0_i32_0 = arith.constant 0 : i32
    return %arg0, %arg1, %c0_i32 : i32, i32, i32
  }
  func.func @transform_1(%arg0: i32, %arg1: i32) -> (i32, i32, i32) {
    %c0_i32 = arith.constant 0 : i32
    %c0_i32_0 = arith.constant 0 : i32
    %c0_i32_1 = arith.constant 0 : i32
    return %arg0, %c0_i32, %c0_i32_0 : i32, i32, i32
  }
  func.func @transform_2(%arg0: i32, %arg1: i32) -> (i32, i32, i32) {
    %c0_i32 = arith.constant 0 : i32
    %c0_i32_0 = arith.constant 0 : i32
    %c0_i32_1 = arith.constant 0 : i32
    return %arg0, %c0_i32, %c0_i32_0 : i32, i32, i32
  }
  func.func @transform_3(%arg0: i32, %arg1: i32) -> (i32, i32) {
    %c0_i32 = arith.constant 0 : i32
    %c0_i32_0 = arith.constant 0 : i32
    %c0_i32_1 = arith.constant 0 : i32
    return %c0_i32, %c0_i32_0 : i32, i32
  }
  func.func @transform_4(%arg0: i32, %arg1: i32) -> (i32, i32) {
    %c0_i32 = arith.constant 0 : i32
    %c0_i32_0 = arith.constant 0 : i32
    %c0_i32_1 = arith.constant 0 : i32
    return %c0_i32, %c0_i32_0 : i32, i32
  }
  func.func @transform_5(%arg0: i32, %arg1: i32) -> (i32, i32) {
    %c0_i32 = arith.constant 0 : i32
    %c0_i32_0 = arith.constant 0 : i32
    %c0_i32_1 = arith.constant 0 : i32
    return %c0_i32, %c0_i32_0 : i32, i32
  }
  func.func @transform_6(%arg0: i32, %arg1: i32) -> (i32, i32) {
    %c0_i32 = arith.constant 0 : i32
    %c0_i32_0 = arith.constant 0 : i32
    %c0_i32_1 = arith.constant 0 : i32
    return %c0_i32, %c0_i32_0 : i32, i32
  }
  func.func @transform_7(%arg0: i32, %arg1: i32) -> (i32, i32) {
    %c0_i32 = arith.constant 0 : i32
    %c0_i32_0 = arith.constant 0 : i32
    %c0_i32_1 = arith.constant 0 : i32
    return %c0_i32, %c0_i32_0 : i32, i32
  }
  func.func @transform_8(%arg0: i32, %arg1: i32) -> (i32, i32) {
    %c0_i32 = arith.constant 0 : i32
    %c0_i32_0 = arith.constant 0 : i32
    %c0_i32_1 = arith.constant 0 : i32
    return %c0_i32, %c0_i32_0 : i32, i32
  }
  func.func @transform_9(%arg0: i32, %arg1: i32) -> (i32, i32) {
    %c0_i32 = arith.constant 0 : i32
    %c0_i32_0 = arith.constant 0 : i32
    %c0_i32_1 = arith.constant 0 : i32
    return %c0_i32, %c0_i32_0 : i32, i32
  }
  func.func @transform_10(%arg0: i32, %arg1: i32) -> (i32, i32) {
    %c0_i32 = arith.constant 0 : i32
    %c0_i32_0 = arith.constant 0 : i32
    %c0_i32_1 = arith.constant 0 : i32
    return %c0_i32, %c0_i32_0 : i32, i32
  }
  func.func @transform_11(%arg0: i32, %arg1: i32) -> (i32, i32, i32) {
    %c0_i32 = arith.constant 0 : i32
    %c0_i32_0 = arith.constant 0 : i32
    return %arg0, %arg1, %c0_i32 : i32, i32, i32
  }
}

module attributes {stable_mosaic.version = 11 : i64} {
  func.func @_ffn_block_kernel(%arg0: i32, %arg1: i32, %arg2: memref<8x32xbf16, #tpu.memory_space<vmem>>, %arg3: memref<32x64xbf16, #tpu.memory_space<vmem>>, %arg4: memref<1x64xf32, #tpu.memory_space<vmem>>, %arg5: memref<64x32xbf16, #tpu.memory_space<vmem>>, %arg6: memref<1x32xf32, #tpu.memory_space<vmem>>, %arg7: memref<1x32xf32, #tpu.memory_space<vmem>>, %arg8: memref<1x32xf32, #tpu.memory_space<vmem>>, %arg9: memref<8x32xbf16, #tpu.memory_space<vmem>>, %arg10: memref<8x32xf32, #tpu.memory_space<vmem>>) attributes {dimension_semantics = [#tpu.dimension_semantics<parallel>, #tpu.dimension_semantics<arbitrary>], iteration_bounds = array<i64: 2, 1>, scalar_prefetch = 0 : i64, scratch_operands = 1 : i64, tpu.core_type = #tpu.core_type<tc>, window_params = [{transform_indices = @transform_0, window_bounds = array<i64: 8, 32>}, {pipeline_mode = #tpu.pipeline_mode<synchronous>, transform_indices = @transform_1, window_bounds = array<i64: 32, 64>}, {pipeline_mode = #tpu.pipeline_mode<synchronous>, transform_indices = @transform_2, window_bounds = array<i64: 1, 64>}, {pipeline_mode = #tpu.pipeline_mode<synchronous>, transform_indices = @transform_3, window_bounds = array<i64: 64, 32>}, {pipeline_mode = #tpu.pipeline_mode<synchronous>, transform_indices = @transform_4, window_bounds = array<i64: 1, 32>}, {pipeline_mode = #tpu.pipeline_mode<synchronous>, transform_indices = @transform_5, window_bounds = array<i64: 1, 32>}, {pipeline_mode = #tpu.pipeline_mode<synchronous>, transform_indices = @transform_6, window_bounds = array<i64: 1, 32>}, {transform_indices = @transform_7, window_bounds = array<i64: 8, 32>}]} {
    %c0_i32 = arith.constant 0 : i32
    %0 = arith.cmpi eq, %arg1, %c0_i32 : i32
    %1 = arith.extui %0 : i1 to i32
    %c0_i32_0 = arith.constant 0 : i32
    %2 = arith.cmpi ne, %1, %c0_i32_0 : i32
    scf.if %2 {
      %cst_16 = arith.constant 0.000000e+00 : f32
      %20 = vector.broadcast %cst_16 : f32 to vector<8x32xf32>
      %c0_17 = arith.constant 0 : index
      %c0_18 = arith.constant 0 : index
      %21 = vector.load %arg10[%c0_17, %c0_18] : memref<8x32xf32, #tpu.memory_space<vmem>>, vector<8x32xf32>
      tpu.vector_store %arg10[%c0_17, %c0_18], %20 {strides = array<i32>} : memref<8x32xf32, #tpu.memory_space<vmem>>, vector<8x32xf32>,
    } else {
    }
    %c0 = arith.constant 0 : index
    %c0_1 = arith.constant 0 : index
    %3 = vector.load %arg2[%c0, %c0_1] : memref<8x32xbf16, #tpu.memory_space<vmem>>, vector<8x32xbf16>
    %c0_2 = arith.constant 0 : index
    %c0_3 = arith.constant 0 : index
    %4 = vector.load %arg3[%c0_2, %c0_3] : memref<32x64xbf16, #tpu.memory_space<vmem>>, vector<32x64xbf16>
    %cst = arith.constant dense<0.000000e+00> : vector<8x64xf32>
    %5 = tpu.matmul %3, %4, %cst {dimension_numbers = #tpu.dot_dimension_numbers<[1], [0], [0], [1], [0, 0, 1, 1], [], []>} : vector<8x32xbf16>, vector<32x64xbf16>, vector<8x64xf32> -> vector<8x64xf32>
    %c0_4 = arith.constant 0 : index
    %c0_5 = arith.constant 0 : index
    %6 = vector.load %arg4[%c0_4, %c0_5] : memref<1x64xf32, #tpu.memory_space<vmem>>, vector<1x64xf32>
    %7 = vector.broadcast %6 : vector<1x64xf32> to vector<8x64xf32>
    %8 = arith.addf %5, %7 : vector<8x64xf32>
    %cst_6 = arith.constant 0.000000e+00 : f32
    %9 = vector.broadcast %cst_6 : f32 to vector<8x64xf32>
    %10 = arith.maximumf %8, %9 : vector<8x64xf32>
    %c0_7 = arith.constant 0 : index
    %c0_8 = arith.constant 0 : index
    %11 = vector.load %arg10[%c0_7, %c0_8] : memref<8x32xf32, #tpu.memory_space<vmem>>, vector<8x32xf32>
    %12 = arith.truncf %10 : vector<8x64xf32> to vector<8x64xbf16>
    %c0_9 = arith.constant 0 : index
    %c0_10 = arith.constant 0 : index
    %13 = vector.load %arg5[%c0_9, %c0_10] : memref<64x32xbf16, #tpu.memory_space<vmem>>, vector<64x32xbf16>
    %cst_11 = arith.constant dense<0.000000e+00> : vector<8x32xf32>
    %14 = tpu.matmul %12, %13, %cst_11 {dimension_numbers = #tpu.dot_dimension_numbers<[1], [0], [0], [1], [0, 0, 1, 1], [], []>} : vector<8x64xbf16>, vector<64x32xbf16>, vector<8x32xf32> -> vector<8x32xf32>
    %15 = arith.addf %11, %14 : vector<8x32xf32>
    %c0_12 = arith.constant 0 : index
    %c0_13 = arith.constant 0 : index
    %16 = vector.load %arg10[%c0_12, %c0_13] : memref<8x32xf32, #tpu.memory_space<vmem>>, vector<8x32xf32>
    tpu.vector_store %arg10[%c0_12, %c0_13], %15 {strides = array<i32>} : memref<8x32xf32, #tpu.memory_space<vmem>>, vector<8x32xf32>,
    %c0_i32_14 = arith.constant 0 : i32
    %17 = arith.cmpi eq, %arg1, %c0_i32_14 : i32
    %18 = arith.extui %17 : i1 to i32
    %c0_i32_15 = arith.constant 0 : i32
    %19 = arith.cmpi ne, %18, %c0_i32_15 : i32
    scf.if %19 {
      %c0_16 = arith.constant 0 : index
      %c0_17 = arith.constant 0 : index
      %20 = vector.load %arg2[%c0_16, %c0_17] : memref<8x32xbf16, #tpu.memory_space<vmem>>, vector<8x32xbf16>
      %21 = arith.extf %20 : vector<8x32xbf16> to vector<8x32xf32>
      %c0_18 = arith.constant 0 : index
      %c0_19 = arith.constant 0 : index
      %22 = vector.load %arg10[%c0_18, %c0_19] : memref<8x32xf32, #tpu.memory_space<vmem>>, vector<8x32xf32>
      %23 = arith.addf %21, %22 : vector<8x32xf32>
      %c0_20 = arith.constant 0 : index
      %c0_21 = arith.constant 0 : index
      %24 = vector.load %arg6[%c0_20, %c0_21] : memref<1x32xf32, #tpu.memory_space<vmem>>, vector<1x32xf32>
      %25 = vector.broadcast %24 : vector<1x32xf32> to vector<8x32xf32>
      %26 = arith.addf %23, %25 : vector<8x32xf32>
      %cst_22 = arith.constant dense<0.000000e+00> : vector<8xf32>
      %27 = vector.multi_reduction <add>, %26, %cst_22 [1] : vector<8x32xf32> to vector<8xf32>
      %28 = vector.shape_cast %27 : vector<8xf32> to vector<8x1xf32>
      %cst_23 = arith.constant 3.200000e+01 : f32
      %29 = vector.broadcast %cst_23 : f32 to vector<8x1xf32>
      %30 = arith.divf %28, %29 : vector<8x1xf32>
      %31 = vector.broadcast %30 : vector<8x1xf32> to vector<8x32xf32>
      %32 = arith.subf %26, %31 : vector<8x32xf32>
      %33 = arith.mulf %32, %32 : vector<8x32xf32>
      %cst_24 = arith.constant dense<0.000000e+00> : vector<8xf32>
      %34 = vector.multi_reduction <add>, %33, %cst_24 [1] : vector<8x32xf32> to vector<8xf32>
      %35 = vector.shape_cast %34 : vector<8xf32> to vector<8x1xf32>
      %cst_25 = arith.constant 3.200000e+01 : f32
      %36 = vector.broadcast %cst_25 : f32 to vector<8x1xf32>
      %37 = arith.divf %35, %36 : vector<8x1xf32>
      %38 = vector.broadcast %30 : vector<8x1xf32> to vector<8x32xf32>
      %39 = arith.subf %26, %38 : vector<8x32xf32>
      %cst_26 = arith.constant 9.99999974E-6 : f32
      %40 = vector.broadcast %cst_26 : f32 to vector<8x1xf32>
      %41 = arith.addf %37, %40 : vector<8x1xf32>
      %42 = math.rsqrt %41 : vector<8x1xf32>
      %43 = vector.broadcast %42 : vector<8x1xf32> to vector<8x32xf32>
      %44 = arith.mulf %39, %43 : vector<8x32xf32>
      %c0_27 = arith.constant 0 : index
      %c0_28 = arith.constant 0 : index
      %45 = vector.load %arg7[%c0_27, %c0_28] : memref<1x32xf32, #tpu.memory_space<vmem>>, vector<1x32xf32>
      %46 = vector.broadcast %45 : vector<1x32xf32> to vector<8x32xf32>
      %47 = arith.mulf %44, %46 : vector<8x32xf32>
      %c0_29 = arith.constant 0 : index
      %c0_30 = arith.constant 0 : index
      %48 = vector.load %arg8[%c0_29, %c0_30] : memref<1x32xf32, #tpu.memory_space<vmem>>, vector<1x32xf32>
      %49 = vector.broadcast %48 : vector<1x32xf32> to vector<8x32xf32>
      %50 = arith.addf %47, %49 : vector<8x32xf32>
      %51 = arith.truncf %50 : vector<8x32xf32> to vector<8x32xbf16>
      %c0_31 = arith.constant 0 : index
      %c0_32 = arith.constant 0 : index
      %52 = vector.load %arg9[%c0_31, %c0_32] : memref<8x32xbf16, #tpu.memory_space<vmem>>, vector<8x32xbf16>
      tpu.vector_store %arg9[%c0_31, %c0_32], %51 {strides = array<i32>} : memref<8x32xbf16, #tpu.memory_space<vmem>>, vector<8x32xbf16>,
    } else {
    }
    return
  }
  func.func @transform_0(%arg0: i32, %arg1: i32) -> (i32, i32) {
    %c0_i32 = arith.constant 0 : i32
    %c0_i32_0 = arith.constant 0 : i32
    return %arg0, %c0_i32 : i32, i32
  }
  func.func @transform_1(%arg0: i32, %arg1: i32) -> (i32, i32) {
    %c0_i32 = arith.constant 0 : i32
    %c0_i32_0 = arith.constant 0 : i32
    %c0_i32_1 = arith.constant 0 : i32
    return %c0_i32, %c0_i32_0 : i32, i32
  }
  func.func @transform_2(%arg0: i32, %arg1: i32) -> (i32, i32) {
    %c0_i32 = arith.constant 0 : i32
    %c0_i32_0 = arith.constant 0 : i32
    %c0_i32_1 = arith.constant 0 : i32
    return %c0_i32, %c0_i32_0 : i32, i32
  }
  func.func @transform_3(%arg0: i32, %arg1: i32) -> (i32, i32) {
    %c0_i32 = arith.constant 0 : i32
    %c0_i32_0 = arith.constant 0 : i32
    %c0_i32_1 = arith.constant 0 : i32
    return %c0_i32, %c0_i32_0 : i32, i32
  }
  func.func @transform_4(%arg0: i32, %arg1: i32) -> (i32, i32) {
    %c0_i32 = arith.constant 0 : i32
    %c0_i32_0 = arith.constant 0 : i32
    %c0_i32_1 = arith.constant 0 : i32
    return %c0_i32, %c0_i32_0 : i32, i32
  }
  func.func @transform_5(%arg0: i32, %arg1: i32) -> (i32, i32) {
    %c0_i32 = arith.constant 0 : i32
    %c0_i32_0 = arith.constant 0 : i32
    %c0_i32_1 = arith.constant 0 : i32
    return %c0_i32, %c0_i32_0 : i32, i32
  }
  func.func @transform_6(%arg0: i32, %arg1: i32) -> (i32, i32) {
    %c0_i32 = arith.constant 0 : i32
    %c0_i32_0 = arith.constant 0 : i32
    %c0_i32_1 = arith.constant 0 : i32
    return %c0_i32, %c0_i32_0 : i32, i32
  }
  func.func @transform_7(%arg0: i32, %arg1: i32) -> (i32, i32) {
    %c0_i32 = arith.constant 0 : i32
    %c0_i32_0 = arith.constant 0 : i32
    return %arg0, %c0_i32 : i32, i32
  }
}

module attributes {stable_mosaic.version = 11 : i64} {
  func.func @_attn_block_kernel(%arg0: i32, %arg1: i32, %arg2: memref<1x8x32xbf16, #tpu.memory_space<vmem>>, %arg3: memref<1x8x32xbf16, #tpu.memory_space<vmem>>, %arg4: memref<1x8x8xf32, #tpu.memory_space<vmem>>, %arg5: memref<32x32xbf16, #tpu.memory_space<vmem>>, %arg6: memref<1x32xf32, #tpu.memory_space<vmem>>, %arg7: memref<32x64xbf16, #tpu.memory_space<vmem>>, %arg8: memref<1x64xf32, #tpu.memory_space<vmem>>, %arg9: memref<32x32xbf16, #tpu.memory_space<vmem>>, %arg10: memref<1x32xf32, #tpu.memory_space<vmem>>, %arg11: memref<1x32xf32, #tpu.memory_space<vmem>>, %arg12: memref<1x32xf32, #tpu.memory_space<vmem>>, %arg13: memref<1x8x32xbf16, #tpu.memory_space<vmem>>) attributes {dimension_semantics = [#tpu.dimension_semantics<parallel>, #tpu.dimension_semantics<parallel>], iteration_bounds = array<i64: 2, 1>, scalar_prefetch = 0 : i64, scratch_operands = 0 : i64, tpu.core_type = #tpu.core_type<tc>, window_params = [{transform_indices = @transform_0, window_bounds = array<i64: 1, 8, 32>}, {transform_indices = @transform_1, window_bounds = array<i64: 1, 8, 32>}, {transform_indices = @transform_2, window_bounds = array<i64: 1, 8, 8>}, {pipeline_mode = #tpu.pipeline_mode<synchronous>, transform_indices = @transform_3, window_bounds = array<i64: 32, 32>}, {pipeline_mode = #tpu.pipeline_mode<synchronous>, transform_indices = @transform_4, window_bounds = array<i64: 1, 32>}, {pipeline_mode = #tpu.pipeline_mode<synchronous>, transform_indices = @transform_5, window_bounds = array<i64: 32, 64>}, {pipeline_mode = #tpu.pipeline_mode<synchronous>, transform_indices = @transform_6, window_bounds = array<i64: 1, 64>}, {pipeline_mode = #tpu.pipeline_mode<synchronous>, transform_indices = @transform_7, window_bounds = array<i64: 32, 32>}, {pipeline_mode = #tpu.pipeline_mode<synchronous>, transform_indices = @transform_8, window_bounds = array<i64: 1, 32>}, {pipeline_mode = #tpu.pipeline_mode<synchronous>, transform_indices = @transform_9, window_bounds = array<i64: 1, 32>}, {pipeline_mode = #tpu.pipeline_mode<synchronous>, transform_indices = @transform_10, window_bounds = array<i64: 1, 32>}, {transform_indices = @transform_11, window_bounds = array<i64: 1, 8, 32>}]} {
    %c0 = arith.constant 0 : index
    %c0_0 = arith.constant 0 : index
    %c0_1 = arith.constant 0 : index
    %0 = vector.load %arg2[%c0, %c0_0, %c0_1] : memref<1x8x32xbf16, #tpu.memory_space<vmem>>, vector<1x8x32xbf16>
    %1 = vector.shape_cast %0 : vector<1x8x32xbf16> to vector<8x32xbf16>
    %c0_2 = arith.constant 0 : index
    %c0_3 = arith.constant 0 : index
    %c0_4 = arith.constant 0 : index
    %2 = vector.load %arg3[%c0_2, %c0_3, %c0_4] : memref<1x8x32xbf16, #tpu.memory_space<vmem>>, vector<1x8x32xbf16>
    %3 = vector.shape_cast %2 : vector<1x8x32xbf16> to vector<8x32xbf16>
    %c0_5 = arith.constant 0 : index
    %c0_6 = arith.constant 0 : index
    %c0_7 = arith.constant 0 : index
    %4 = vector.load %arg4[%c0_5, %c0_6, %c0_7] : memref<1x8x8xf32, #tpu.memory_space<vmem>>, vector<1x8x8xf32>
    %5 = vector.shape_cast %4 : vector<1x8x8xf32> to vector<8x8xf32>
    %cst = arith.constant 0.000000e+00 : f32
    %6 = vector.broadcast %cst : f32 to vector<8x8xf32>
    %7 = arith.cmpf oeq, %5, %6 : vector<8x8xf32>
    %cst_8 = arith.constant -1.000000e+09 : f32
    %cst_9 = arith.constant 0.000000e+00 : f32
    %8 = vector.broadcast %cst_8 : f32 to vector<8x8xf32>
    %9 = vector.broadcast %cst_9 : f32 to vector<8x8xf32>
    %10 = arith.select %7, %8, %9 : vector<8x8xi1>, vector<8x8xf32>
    %c0_10 = arith.constant 0 : index
    %c0_11 = arith.constant 0 : index
    %11 = vector.load %arg5[%c0_10, %c0_11] : memref<32x32xbf16, #tpu.memory_space<vmem>>, vector<32x32xbf16>
    %cst_12 = arith.constant dense<0.000000e+00> : vector<8x32xf32>
    %12 = tpu.matmul %1, %11, %cst_12 {dimension_numbers = #tpu.dot_dimension_numbers<[1], [0], [0], [1], [0, 0, 1, 1], [], []>} : vector<8x32xbf16>, vector<32x32xbf16>, vector<8x32xf32> -> vector<8x32xf32>
    %c0_13 = arith.constant 0 : index
    %c0_14 = arith.constant 0 : index
    %13 = vector.load %arg6[%c0_13, %c0_14] : memref<1x32xf32, #tpu.memory_space<vmem>>, vector<1x32xf32>
    %14 = vector.broadcast %13 : vector<1x32xf32> to vector<8x32xf32>
    %15 = arith.addf %12, %14 : vector<8x32xf32>
    %c0_15 = arith.constant 0 : index
    %c0_16 = arith.constant 0 : index
    %16 = vector.load %arg7[%c0_15, %c0_16] : memref<32x64xbf16, #tpu.memory_space<vmem>>, vector<32x64xbf16>
    %cst_17 = arith.constant dense<0.000000e+00> : vector<8x64xf32>
    %17 = tpu.matmul %3, %16, %cst_17 {dimension_numbers = #tpu.dot_dimension_numbers<[1], [0], [0], [1], [0, 0, 1, 1], [], []>} : vector<8x32xbf16>, vector<32x64xbf16>, vector<8x64xf32> -> vector<8x64xf32>
    %c0_18 = arith.constant 0 : index
    %c0_19 = arith.constant 0 : index
    %18 = vector.load %arg8[%c0_18, %c0_19] : memref<1x64xf32, #tpu.memory_space<vmem>>, vector<1x64xf32>
    %19 = vector.broadcast %18 : vector<1x64xf32> to vector<8x64xf32>
    %20 = arith.addf %17, %19 : vector<8x64xf32>
    %21 = vector.extract_strided_slice %20 {offsets = [0, 0], sizes = [8, 32], strides = [1, 1]} : vector<8x64xf32> to vector<8x32xf32>
    %22 = vector.extract_strided_slice %20 {offsets = [0, 32], sizes = [8, 32], strides = [1, 1]} : vector<8x64xf32> to vector<8x32xf32>
    %cst_20 = arith.constant 0.353553385 : f32
    %23 = vector.broadcast %cst_20 : f32 to vector<8x32xf32>
    %24 = arith.mulf %15, %23 : vector<8x32xf32>
    %25 = arith.truncf %24 : vector<8x32xf32> to vector<8x32xbf16>
    %26 = arith.truncf %21 : vector<8x32xf32> to vector<8x32xbf16>
    %27 = arith.truncf %22 : vector<8x32xf32> to vector<8x32xbf16>
    %28 = vector.extract_strided_slice %25 {offsets = [0, 0], sizes = [8, 8], strides = [1, 1]} : vector<8x32xbf16> to vector<8x8xbf16>
    %29 = vector.extract_strided_slice %26 {offsets = [0, 0], sizes = [8, 8], strides = [1, 1]} : vector<8x32xbf16> to vector<8x8xbf16>
    %cst_21 = arith.constant dense<0.000000e+00> : vector<8x8xf32>
    %30 = tpu.matmul %28, %29, %cst_21 {dimension_numbers = #tpu.dot_dimension_numbers<[1], [1], [0], [0], [0, 0, 1, 0], [], []>} : vector<8x8xbf16>, vector<8x8xbf16>, vector<8x8xf32> -> vector<8x8xf32>
    %31 = arith.addf %30, %10 : vector<8x8xf32>
    %cst_22 = arith.constant dense<0xFF800000> : vector<8xf32>
    %32 = vector.multi_reduction <maximumf>, %31, %cst_22 [1] : vector<8x8xf32> to vector<8xf32>
    %33 = vector.shape_cast %32 : vector<8xf32> to vector<8x1xf32>
    %34 = vector.broadcast %33 : vector<8x1xf32> to vector<8x8xf32>
    %35 = arith.subf %31, %34 : vector<8x8xf32>
    %36 = math.exp %35 : vector<8x8xf32>
    %cst_23 = arith.constant dense<0.000000e+00> : vector<8xf32>
    %37 = vector.multi_reduction <add>, %36, %cst_23 [1] : vector<8x8xf32> to vector<8xf32>
    %38 = vector.shape_cast %37 : vector<8xf32> to vector<8x1xf32>
    %39 = tpu.reciprocal %38 {approx = true} : vector<8x1xf32> -> vector<8x1xf32>
    %40 = vector.broadcast %39 : vector<8x1xf32> to vector<8x8xf32>
    %41 = arith.mulf %36, %40 : vector<8x8xf32>
    %42 = arith.truncf %41 : vector<8x8xf32> to vector<8x8xbf16>
    %43 = vector.extract_strided_slice %27 {offsets = [0, 0], sizes = [8, 8], strides = [1, 1]} : vector<8x32xbf16> to vector<8x8xbf16>
    %cst_24 = arith.constant dense<0.000000e+00> : vector<8x8xf32>
    %44 = tpu.matmul %42, %43, %cst_24 {dimension_numbers = #tpu.dot_dimension_numbers<[1], [0], [0], [1], [0, 0, 1, 1], [], []>} : vector<8x8xbf16>, vector<8x8xbf16>, vector<8x8xf32> -> vector<8x8xf32>
    %45 = arith.truncf %44 : vector<8x8xf32> to vector<8x8xbf16>
    %46 = vector.extract_strided_slice %25 {offsets = [0, 8], sizes = [8, 8], strides = [1, 1]} : vector<8x32xbf16> to vector<8x8xbf16>
    %47 = vector.extract_strided_slice %26 {offsets = [0, 8], sizes = [8, 8], strides = [1, 1]} : vector<8x32xbf16> to vector<8x8xbf16>
    %cst_25 = arith.constant dense<0.000000e+00> : vector<8x8xf32>
    %48 = tpu.matmul %46, %47, %cst_25 {dimension_numbers = #tpu.dot_dimension_numbers<[1], [1], [0], [0], [0, 0, 1, 0], [], []>} : vector<8x8xbf16>, vector<8x8xbf16>, vector<8x8xf32> -> vector<8x8xf32>
    %49 = arith.addf %48, %10 : vector<8x8xf32>
    %cst_26 = arith.constant dense<0xFF800000> : vector<8xf32>
    %50 = vector.multi_reduction <maximumf>, %49, %cst_26 [1] : vector<8x8xf32> to vector<8xf32>
    %51 = vector.shape_cast %50 : vector<8xf32> to vector<8x1xf32>
    %52 = vector.broadcast %51 : vector<8x1xf32> to vector<8x8xf32>
    %53 = arith.subf %49, %52 : vector<8x8xf32>
    %54 = math.exp %53 : vector<8x8xf32>
    %cst_27 = arith.constant dense<0.000000e+00> : vector<8xf32>
    %55 = vector.multi_reduction <add>, %54, %cst_27 [1] : vector<8x8xf32> to vector<8xf32>
    %56 = vector.shape_cast %55 : vector<8xf32> to vector<8x1xf32>
    %57 = tpu.reciprocal %56 {approx = true} : vector<8x1xf32> -> vector<8x1xf32>
    %58 = vector.broadcast %57 : vector<8x1xf32> to vector<8x8xf32>
    %59 = arith.mulf %54, %58 : vector<8x8xf32>
    %60 = arith.truncf %59 : vector<8x8xf32> to vector<8x8xbf16>
    %61 = vector.extract_strided_slice %27 {offsets = [0, 8], sizes = [8, 8], strides = [1, 1]} : vector<8x32xbf16> to vector<8x8xbf16>
    %cst_28 = arith.constant dense<0.000000e+00> : vector<8x8xf32>
    %62 = tpu.matmul %60, %61, %cst_28 {dimension_numbers = #tpu.dot_dimension_numbers<[1], [0], [0], [1], [0, 0, 1, 1], [], []>} : vector<8x8xbf16>, vector<8x8xbf16>, vector<8x8xf32> -> vector<8x8xf32>
    %63 = arith.truncf %62 : vector<8x8xf32> to vector<8x8xbf16>
    %64 = vector.extract_strided_slice %25 {offsets = [0, 16], sizes = [8, 8], strides = [1, 1]} : vector<8x32xbf16> to vector<8x8xbf16>
    %65 = vector.extract_strided_slice %26 {offsets = [0, 16], sizes = [8, 8], strides = [1, 1]} : vector<8x32xbf16> to vector<8x8xbf16>
    %cst_29 = arith.constant dense<0.000000e+00> : vector<8x8xf32>
    %66 = tpu.matmul %64, %65, %cst_29 {dimension_numbers = #tpu.dot_dimension_numbers<[1], [1], [0], [0], [0, 0, 1, 0], [], []>} : vector<8x8xbf16>, vector<8x8xbf16>, vector<8x8xf32> -> vector<8x8xf32>
    %67 = arith.addf %66, %10 : vector<8x8xf32>
    %cst_30 = arith.constant dense<0xFF800000> : vector<8xf32>
    %68 = vector.multi_reduction <maximumf>, %67, %cst_30 [1] : vector<8x8xf32> to vector<8xf32>
    %69 = vector.shape_cast %68 : vector<8xf32> to vector<8x1xf32>
    %70 = vector.broadcast %69 : vector<8x1xf32> to vector<8x8xf32>
    %71 = arith.subf %67, %70 : vector<8x8xf32>
    %72 = math.exp %71 : vector<8x8xf32>
    %cst_31 = arith.constant dense<0.000000e+00> : vector<8xf32>
    %73 = vector.multi_reduction <add>, %72, %cst_31 [1] : vector<8x8xf32> to vector<8xf32>
    %74 = vector.shape_cast %73 : vector<8xf32> to vector<8x1xf32>
    %75 = tpu.reciprocal %74 {approx = true} : vector<8x1xf32> -> vector<8x1xf32>
    %76 = vector.broadcast %75 : vector<8x1xf32> to vector<8x8xf32>
    %77 = arith.mulf %72, %76 : vector<8x8xf32>
    %78 = arith.truncf %77 : vector<8x8xf32> to vector<8x8xbf16>
    %79 = vector.extract_strided_slice %27 {offsets = [0, 16], sizes = [8, 8], strides = [1, 1]} : vector<8x32xbf16> to vector<8x8xbf16>
    %cst_32 = arith.constant dense<0.000000e+00> : vector<8x8xf32>
    %80 = tpu.matmul %78, %79, %cst_32 {dimension_numbers = #tpu.dot_dimension_numbers<[1], [0], [0], [1], [0, 0, 1, 1], [], []>} : vector<8x8xbf16>, vector<8x8xbf16>, vector<8x8xf32> -> vector<8x8xf32>
    %81 = arith.truncf %80 : vector<8x8xf32> to vector<8x8xbf16>
    %82 = vector.extract_strided_slice %25 {offsets = [0, 24], sizes = [8, 8], strides = [1, 1]} : vector<8x32xbf16> to vector<8x8xbf16>
    %83 = vector.extract_strided_slice %26 {offsets = [0, 24], sizes = [8, 8], strides = [1, 1]} : vector<8x32xbf16> to vector<8x8xbf16>
    %cst_33 = arith.constant dense<0.000000e+00> : vector<8x8xf32>
    %84 = tpu.matmul %82, %83, %cst_33 {dimension_numbers = #tpu.dot_dimension_numbers<[1], [1], [0], [0], [0, 0, 1, 0], [], []>} : vector<8x8xbf16>, vector<8x8xbf16>, vector<8x8xf32> -> vector<8x8xf32>
    %85 = arith.addf %84, %10 : vector<8x8xf32>
    %cst_34 = arith.constant dense<0xFF800000> : vector<8xf32>
    %86 = vector.multi_reduction <maximumf>, %85, %cst_34 [1] : vector<8x8xf32> to vector<8xf32>
    %87 = vector.shape_cast %86 : vector<8xf32> to vector<8x1xf32>
    %88 = vector.broadcast %87 : vector<8x1xf32> to vector<8x8xf32>
    %89 = arith.subf %85, %88 : vector<8x8xf32>
    %90 = math.exp %89 : vector<8x8xf32>
    %cst_35 = arith.constant dense<0.000000e+00> : vector<8xf32>
    %91 = vector.multi_reduction <add>, %90, %cst_35 [1] : vector<8x8xf32> to vector<8xf32>
    %92 = vector.shape_cast %91 : vector<8xf32> to vector<8x1xf32>
    %93 = tpu.reciprocal %92 {approx = true} : vector<8x1xf32> -> vector<8x1xf32>
    %94 = vector.broadcast %93 : vector<8x1xf32> to vector<8x8xf32>
    %95 = arith.mulf %90, %94 : vector<8x8xf32>
    %96 = arith.truncf %95 : vector<8x8xf32> to vector<8x8xbf16>
    %97 = vector.extract_strided_slice %27 {offsets = [0, 24], sizes = [8, 8], strides = [1, 1]} : vector<8x32xbf16> to vector<8x8xbf16>
    %cst_36 = arith.constant dense<0.000000e+00> : vector<8x8xf32>
    %98 = tpu.matmul %96, %97, %cst_36 {dimension_numbers = #tpu.dot_dimension_numbers<[1], [0], [0], [1], [0, 0, 1, 1], [], []>} : vector<8x8xbf16>, vector<8x8xbf16>, vector<8x8xf32> -> vector<8x8xf32>
    %99 = arith.truncf %98 : vector<8x8xf32> to vector<8x8xbf16>
    %100 = tpu.concatenate %45, %63, %81, %99 in 1 : vector<8x8xbf16>, vector<8x8xbf16>, vector<8x8xbf16>, vector<8x8xbf16> -> vector<8x32xbf16>
    %c0_37 = arith.constant 0 : index
    %c0_38 = arith.constant 0 : index
    %101 = vector.load %arg9[%c0_37, %c0_38] : memref<32x32xbf16, #tpu.memory_space<vmem>>, vector<32x32xbf16>
    %cst_39 = arith.constant dense<0.000000e+00> : vector<8x32xf32>
    %102 = tpu.matmul %100, %101, %cst_39 {dimension_numbers = #tpu.dot_dimension_numbers<[1], [0], [0], [1], [0, 0, 1, 1], [], []>} : vector<8x32xbf16>, vector<32x32xbf16>, vector<8x32xf32> -> vector<8x32xf32>
    %c0_40 = arith.constant 0 : index
    %c0_41 = arith.constant 0 : index
    %103 = vector.load %arg10[%c0_40, %c0_41] : memref<1x32xf32, #tpu.memory_space<vmem>>, vector<1x32xf32>
    %104 = vector.broadcast %103 : vector<1x32xf32> to vector<8x32xf32>
    %105 = arith.addf %102, %104 : vector<8x32xf32>
    %106 = arith.extf %1 : vector<8x32xbf16> to vector<8x32xf32>
    %107 = arith.addf %106, %105 : vector<8x32xf32>
    %cst_42 = arith.constant dense<0.000000e+00> : vector<8xf32>
    %108 = vector.multi_reduction <add>, %107, %cst_42 [1] : vector<8x32xf32> to vector<8xf32>
    %109 = vector.shape_cast %108 : vector<8xf32> to vector<8x1xf32>
    %cst_43 = arith.constant 3.200000e+01 : f32
    %110 = vector.broadcast %cst_43 : f32 to vector<8x1xf32>
    %111 = arith.divf %109, %110 : vector<8x1xf32>
    %112 = vector.broadcast %111 : vector<8x1xf32> to vector<8x32xf32>
    %113 = arith.subf %107, %112 : vector<8x32xf32>
    %114 = arith.mulf %113, %113 : vector<8x32xf32>
    %cst_44 = arith.constant dense<0.000000e+00> : vector<8xf32>
    %115 = vector.multi_reduction <add>, %114, %cst_44 [1] : vector<8x32xf32> to vector<8xf32>
    %116 = vector.shape_cast %115 : vector<8xf32> to vector<8x1xf32>
    %cst_45 = arith.constant 3.200000e+01 : f32
    %117 = vector.broadcast %cst_45 : f32 to vector<8x1xf32>
    %118 = arith.divf %116, %117 : vector<8x1xf32>
    %119 = vector.broadcast %111 : vector<8x1xf32> to vector<8x32xf32>
    %120 = arith.subf %107, %119 : vector<8x32xf32>
    %cst_46 = arith.constant 9.99999974E-6 : f32
    %121 = vector.broadcast %cst_46 : f32 to vector<8x1xf32>
    %122 = arith.addf %118, %121 : vector<8x1xf32>
    %123 = math.rsqrt %122 : vector<8x1xf32>
    %124 = vector.broadcast %123 : vector<8x1xf32> to vector<8x32xf32>
    %125 = arith.mulf %120, %124 : vector<8x32xf32>
    %c0_47 = arith.constant 0 : index
    %c0_48 = arith.constant 0 : index
    %126 = vector.load %arg11[%c0_47, %c0_48] : memref<1x32xf32, #tpu.memory_space<vmem>>, vector<1x32xf32>
    %127 = vector.broadcast %126 : vector<1x32xf32> to vector<8x32xf32>
    %128 = arith.mulf %125, %127 : vector<8x32xf32>
    %c0_49 = arith.constant 0 : index
    %c0_50 = arith.constant 0 : index
    %129 = vector.load %arg12[%c0_49, %c0_50] : memref<1x32xf32, #tpu.memory_space<vmem>>, vector<1x32xf32>
    %130 = vector.broadcast %129 : vector<1x32xf32> to vector<8x32xf32>
    %131 = arith.addf %128, %130 : vector<8x32xf32>
    %132 = arith.truncf %131 : vector<8x32xf32> to vector<8x32xbf16>
    %c0_51 = arith.constant 0 : index
    %c0_52 = arith.constant 0 : index
    %c0_53 = arith.constant 0 : index
    %133 = vector.load %arg13[%c0_51, %c0_52, %c0_53] : memref<1x8x32xbf16, #tpu.memory_space<vmem>>, vector<1x8x32xbf16>
    %134 = vector.shape_cast %133 : vector<1x8x32xbf16> to vector<8x32xbf16>
    %135 = vector.shape_cast %132 : vector<8x32xbf16> to vector<1x8x32xbf16>
    tpu.vector_store %arg13[%c0_51, %c0_52, %c0_53], %135 {strides = array<i32>} : memref<1x8x32xbf16, #tpu.memory_space<vmem>>, vector<1x8x32xbf16>,
    return
  }
  func.func @transform_0(%arg0: i32, %arg1: i32) -> (i32, i32, i32) {
    %c0_i32 = arith.constant 0 : i32
    %c0_i32_0 = arith.constant 0 : i32
    return %arg0, %arg1, %c0_i32 : i32, i32, i32
  }
  func.func @transform_1(%arg0: i32, %arg1: i32) -> (i32, i32, i32) {
    %c0_i32 = arith.constant 0 : i32
    %c0_i32_0 = arith.constant 0 : i32
    %c0_i32_1 = arith.constant 0 : i32
    return %arg0, %c0_i32, %c0_i32_0 : i32, i32, i32
  }
  func.func @transform_2(%arg0: i32, %arg1: i32) -> (i32, i32, i32) {
    %c0_i32 = arith.constant 0 : i32
    %c0_i32_0 = arith.constant 0 : i32
    %c0_i32_1 = arith.constant 0 : i32
    return %c0_i32, %arg1, %c0_i32_0 : i32, i32, i32
  }
  func.func @transform_3(%arg0: i32, %arg1: i32) -> (i32, i32) {
    %c0_i32 = arith.constant 0 : i32
    %c0_i32_0 = arith.constant 0 : i32
    %c0_i32_1 = arith.constant 0 : i32
    return %c0_i32, %c0_i32_0 : i32, i32
  }
  func.func @transform_4(%arg0: i32, %arg1: i32) -> (i32, i32) {
    %c0_i32 = arith.constant 0 : i32
    %c0_i32_0 = arith.constant 0 : i32
    %c0_i32_1 = arith.constant 0 : i32
    return %c0_i32, %c0_i32_0 : i32, i32
  }
  func.func @transform_5(%arg0: i32, %arg1: i32) -> (i32, i32) {
    %c0_i32 = arith.constant 0 : i32
    %c0_i32_0 = arith.constant 0 : i32
    %c0_i32_1 = arith.constant 0 : i32
    return %c0_i32, %c0_i32_0 : i32, i32
  }
  func.func @transform_6(%arg0: i32, %arg1: i32) -> (i32, i32) {
    %c0_i32 = arith.constant 0 : i32
    %c0_i32_0 = arith.constant 0 : i32
    %c0_i32_1 = arith.constant 0 : i32
    return %c0_i32, %c0_i32_0 : i32, i32
  }
  func.func @transform_7(%arg0: i32, %arg1: i32) -> (i32, i32) {
    %c0_i32 = arith.constant 0 : i32
    %c0_i32_0 = arith.constant 0 : i32
    %c0_i32_1 = arith.constant 0 : i32
    return %c0_i32, %c0_i32_0 : i32, i32
  }
  func.func @transform_8(%arg0: i32, %arg1: i32) -> (i32, i32) {
    %c0_i32 = arith.constant 0 : i32
    %c0_i32_0 = arith.constant 0 : i32
    %c0_i32_1 = arith.constant 0 : i32
    return %c0_i32, %c0_i32_0 : i32, i32
  }
  func.func @transform_9(%arg0: i32, %arg1: i32) -> (i32, i32) {
    %c0_i32 = arith.constant 0 : i32
    %c0_i32_0 = arith.constant 0 : i32
    %c0_i32_1 = arith.constant 0 : i32
    return %c0_i32, %c0_i32_0 : i32, i32
  }
  func.func @transform_10(%arg0: i32, %arg1: i32) -> (i32, i32) {
    %c0_i32 = arith.constant 0 : i32
    %c0_i32_0 = arith.constant 0 : i32
    %c0_i32_1 = arith.constant 0 : i32
    return %c0_i32, %c0_i32_0 : i32, i32
  }
  func.func @transform_11(%arg0: i32, %arg1: i32) -> (i32, i32, i32) {
    %c0_i32 = arith.constant 0 : i32
    %c0_i32_0 = arith.constant 0 : i32
    return %arg0, %arg1, %c0_i32 : i32, i32, i32
  }
}

module attributes {stable_mosaic.version = 11 : i64} {
  func.func @_linear_kernel(%arg0: i32, %arg1: i32, %arg2: i32, %arg3: memref<8x32xbf16, #tpu.memory_space<vmem>>, %arg4: memref<32x16xbf16, #tpu.memory_space<vmem>>, %arg5: memref<1x16xf32, #tpu.memory_space<vmem>>, %arg6: memref<8x16xf32, #tpu.memory_space<vmem>>, %arg7: memref<8x16xf32, #tpu.memory_space<vmem>>) attributes {dimension_semantics = [#tpu.dimension_semantics<parallel>, #tpu.dimension_semantics<parallel>, #tpu.dimension_semantics<arbitrary>], iteration_bounds = array<i64: 2, 1, 1>, scalar_prefetch = 0 : i64, scratch_operands = 1 : i64, tpu.core_type = #tpu.core_type<tc>, window_params = [{transform_indices = @transform_0, window_bounds = array<i64: 8, 32>}, {transform_indices = @transform_1, window_bounds = array<i64: 32, 16>}, {transform_indices = @transform_2, window_bounds = array<i64: 1, 16>}, {transform_indices = @transform_3, window_bounds = array<i64: 8, 16>}]} {
    %c0_i32 = arith.constant 0 : i32
    %0 = arith.cmpi eq, %arg2, %c0_i32 : i32
    %1 = arith.extui %0 : i1 to i32
    %c0_i32_0 = arith.constant 0 : i32
    %2 = arith.cmpi ne, %1, %c0_i32_0 : i32
    scf.if %2 {
      %cst_10 = arith.constant 0.000000e+00 : f32
      %12 = vector.broadcast %cst_10 : f32 to vector<8x16xf32>
      %c0_11 = arith.constant 0 : index
      %c0_12 = arith.constant 0 : index
      %13 = vector.load %arg7[%c0_11, %c0_12] : memref<8x16xf32, #tpu.memory_space<vmem>>, vector<8x16xf32>
      tpu.vector_store %arg7[%c0_11, %c0_12], %12 {strides = array<i32>} : memref<8x16xf32, #tpu.memory_space<vmem>>, vector<8x16xf32>,
    } else {
    }
    %c0 = arith.constant 0 : index
    %c0_1 = arith.constant 0 : index
    %3 = vector.load %arg7[%c0, %c0_1] : memref<8x16xf32, #tpu.memory_space<vmem>>, vector<8x16xf32>
    %c0_2 = arith.constant 0 : index
    %c0_3 = arith.constant 0 : index
    %4 = vector.load %arg3[%c0_2, %c0_3] : memref<8x32xbf16, #tpu.memory_space<vmem>>, vector<8x32xbf16>
    %c0_4 = arith.constant 0 : index
    %c0_5 = arith.constant 0 : index
    %5 = vector.load %arg4[%c0_4, %c0_5] : memref<32x16xbf16, #tpu.memory_space<vmem>>, vector<32x16xbf16>
    %cst = arith.constant dense<0.000000e+00> : vector<8x16xf32>
    %6 = tpu.matmul %4, %5, %cst {dimension_numbers = #tpu.dot_dimension_numbers<[1], [0], [0], [1], [0, 0, 1, 1], [], []>} : vector<8x32xbf16>, vector<32x16xbf16>, vector<8x16xf32> -> vector<8x16xf32>
    %7 = arith.addf %3, %6 : vector<8x16xf32>
    %c0_6 = arith.constant 0 : index
    %c0_7 = arith.constant 0 : index
    %8 = vector.load %arg7[%c0_6, %c0_7] : memref<8x16xf32, #tpu.memory_space<vmem>>, vector<8x16xf32>
    tpu.vector_store %arg7[%c0_6, %c0_7], %7 {strides = array<i32>} : memref<8x16xf32, #tpu.memory_space<vmem>>, vector<8x16xf32>,
    %c0_i32_8 = arith.constant 0 : i32
    %9 = arith.cmpi eq, %arg2, %c0_i32_8 : i32
    %10 = arith.extui %9 : i1 to i32
    %c0_i32_9 = arith.constant 0 : i32
    %11 = arith.cmpi ne, %10, %c0_i32_9 : i32
    scf.if %11 {
      %c0_10 = arith.constant 0 : index
      %c0_11 = arith.constant 0 : index
      %12 = vector.load %arg7[%c0_10, %c0_11] : memref<8x16xf32, #tpu.memory_space<vmem>>, vector<8x16xf32>
      %c0_12 = arith.constant 0 : index
      %c0_13 = arith.constant 0 : index
      %13 = vector.load %arg5[%c0_12, %c0_13] : memref<1x16xf32, #tpu.memory_space<vmem>>, vector<1x16xf32>
      %14 = vector.broadcast %13 : vector<1x16xf32> to vector<8x16xf32>
      %15 = arith.addf %12, %14 : vector<8x16xf32>
      %c0_14 = arith.constant 0 : index
      %c0_15 = arith.constant 0 : index
      %16 = vector.load %arg6[%c0_14, %c0_15] : memref<8x16xf32, #tpu.memory_space<vmem>>, vector<8x16xf32>
      tpu.vector_store %arg6[%c0_14, %c0_15], %15 {strides = array<i32>} : memref<8x16xf32, #tpu.memory_space<vmem>>, vector<8x16xf32>,
    } else {
    }
    return
  }
  func.func @transform_0(%arg0: i32, %arg1: i32, %arg2: i32) -> (i32, i32) {
    %c0_i32 = arith.constant 0 : i32
    return %arg0, %arg2 : i32, i32
  }
  func.func @transform_1(%arg0: i32, %arg1: i32, %arg2: i32) -> (i32, i32) {
    %c0_i32 = arith.constant 0 : i32
    return %arg2, %arg1 : i32, i32
  }
  func.func @transform_2(%arg0: i32, %arg1: i32, %arg2: i32) -> (i32, i32) {
    %c0_i32 = arith.constant 0 : i32
    %c0_i32_0 = arith.constant 0 : i32
    return %c0_i32, %arg1 : i32, i32
  }
  func.func @transform_3(%arg0: i32, %arg1: i32, %arg2: i32) -> (i32, i32) {
    %c0_i32 = arith.constant 0 : i32
    return %arg0, %arg1 : i32, i32
  }
}

</mosaic_0001>

<bundles_post_ra>
// kernel: tpu_custom_call.1
= control target key start
LH: loop header
LB: loop body
LE: loop exit
PB: predicated region body
PF: predicated region fallthrough
CT: control target
= control target key end

     0   :  { %6 = vsyncpa [#allocation3], 0  ;;  %s482_s0 = inlined_call_operand.hbm [shape: f32[8,128], index: 0, kind: input, shape index: {}]   ;;  %s483_s1 = inlined_call_operand.hbm [shape: f32[16,128], index: 1, kind: output, shape index: {}]  }
   0x1   :  { %7 = vsyncpa [#allocation4], 0 }
   0x2   :  { %9 = vsyncpa [#allocation4 + $0x1], 0  ;;  %s352_s6 = smov 0   ;;  %s354_s7 = smov 0  }
   0x3   :  { %s356_s8 = smov 0   ;;  %s358_s9 = smov 0  }
   0x4 LB: > { %s373_s10 = sadd.s32 4294967295, %s338_s9   ;;  %s184_s11 = sadd.s32 4294967294, %s338_s9   ;;  %s338_s9 = sphi %s358_s9, %s499_s9   ;;  %s334_s8 = sphi %s356_s8, %s498_s8   ;;  %s330_s7 = sphi %s354_s7, %s497_s7   ;;  %s326_s6 = sphi %s352_s6, %s496_s6  }
   0x5   : > { %s377_s12 = sadd.s32 1, %s338_s9   ;;  %s43_s13 = sadd.s32 1, %s334_s8 }
   0x6   : > { %s40_s14 = ssub.s32 %s338_s9, %s377_s12  ;;  %p53_p0 = scmp.ne.s32.totalorder %s334_s8, %s330_s7 }
   0x7   : > { %p41_p1 = scmp.eq.s32.totalorder %s40_s14, 0  ;;  %p54_p2 = scmp.eq.s32.totalorder %s373_s10, 1 }
   0x8   : > { %p59_p3 = scmp.ne.s32.totalorder %s330_s7, %s326_s6  ;;  %p60_p4 = scmp.eq.s32.totalorder %s184_s11, 1 }
   0x9   : > { %s388_s15 = scalar_select %p41_p1, %s334_s8, %s43_s13  }
   0xa   : > { %p390_p5 = por %p54_p2, %p53_p0  ;;  %p394_p6 = por %p60_p4, %p59_p3 }
   0xb   : > { %p185_p7 = scmp.ge.s32.totalorder %s338_s9, 1  ;;  %p67_p8 = scmp.lt.s32.totalorder %s338_s9, 3 }
   0xc   : > { %s487_s16 = scalar_select %p390_p5, 1, 0 }
   0xd   : > { %s488_s17 = scalar_select %p394_p6, 1, 0 }
   0xe   : > { %p484_p9 = scmp.eq.s32.totalorder %s373_s10, 0  ;;  %p401_p10 = pnand %p185_p7, %p67_p8 }
   0xf   : > { %s340_s19 = smov [#allocation2]   ;;  %s244_s24 = scalar_lea.hbm %s482_s0, 128 }
  0x10   : > { %s489_s18 = scalar_select %p401_p10, 1, 0 }
  0x11   : > { %s80_s20 = sshll.u32 %s340_s19, 4  ;;  %p200_p11 = pneg %p401_p10  ;;  %s81_s20 = int_to_ptr.vmem [resolvable:$true] %s80_s20 }
  0x12   : > { %p245_p13 = scmp.ne.s32.totalorder %s482_s0, %s244_s24  ;;  %p251_p3 = scmp.lt.u32.totalorder %s244_s24, %s482_s0 }
  0x13   : > { %p409_p12 = pnand %p484_p9, %p200_p11 }
  0x15   : > { %p246_p0 = pneg %p409_p12 }
  0x17   : > { %p247_p1 = pnand %p246_p0, %p245_p13 }
  0x19   : > { %p248_p2 = pneg %p247_p1 }
  0x1b   : > { %p253_p4 = pnand %p251_p3, %p248_p2 }
  0x1d   : > { %256 = shalt.err (!%p253_p4)
}
  0x1e   : > { %s257_s29 = scalar_lea.vmem %s81_s20, 128  ;;  %p265_p9 = scmp.lt.s32.totalorder %s81_s20, %s81_s20 }
  0x1f   : > { %p258_p7 = scmp.ne.s32.totalorder %s81_s20, %s257_s29  ;;  %p266_p6 = scmp.lt.s32.totalorder %s257_s29, %s257_s29 }
  0x21   : > { %p260_p8 = pnand %p258_p7, %p246_p0  ;;  %p267_p5 = por %p266_p6, %p265_p9 }
  0x23   : > { %p261_p11 = pneg %p260_p8 }
  0x25   : > { %p268_p10 = pnand %p267_p5, %p261_p11 }
  0x27   : > { %271 = shalt.err (!%p268_p10)
}
  0x28   : > { %203 = dma.hbm_to_vmem [thread:$0]  (!%p409_p12), %s482_s0, 128, %s81_s20, [#allocation3]  }
  0x29   : > { %p491_p13 = scmp.ne.s32.totalorder %s489_s18, 0 }
  0x2a   : > { %p492_p1 = scmp.eq.s32.totalorder (!%p491_p13), %s373_s10, 0 }
  0x2b   : > { %93 = sbr.rel (%p491_p13) target bundleno = 77 (0x4d), region = 24 }
  0x32   : > { %317 = dma.done.wait (%p492_p1), [#allocation3], 128   ;;  %p493_p0 = pmov %p492_p1 }
  0x33   : > { %s105_s3 = sand.u32 1, %s330_s7   ;;  %s191_s13 = sshll.u32 %s373_s10, 7  ;;  %v108_v0 = vld [vmem:[#allocation2] sm:$0xff] }
  0x34   : > { %319 = vsyncadd (%p493_p0), [#allocation3], 4294967168  ;;  %s189_s4 = sshll.u32 %s105_s3, 3  ;;  %v109_v1 = vadd.f32 1.0, %v108_v0  ;;  %s442_s19 = scalar_lea.hbm %s483_s1, %s191_s13 }
  0x35   : > { %s107_s5 = scalar_lea.vmem [#allocation5], %s189_s4  ;;  %s112_s20 = scalar_lea.sflag [#allocation4], %s105_s3 }
  0x36   : > { %s125_s11 = sshll.u32 %s107_s5, 4  ;;  %110 = vst [vmem:[%s107_s5] sm:$0xff] %v109_v1  ;;  %p494_p6 = scmp.ne.s32.totalorder %s487_s16, 0  ;;  %s437_s11 = int_to_ptr.vmem [resolvable:$true] %s125_s11 }
  0x37   : > { %s272_s21 = scalar_lea.vmem %s437_s11, 128  ;;  %s341_s10 = smov [#allocation5]  }
  0x38   : > { %p273_p5 = scmp.ne.s32.totalorder %s437_s11, %s272_s21  ;;  %s276_s22 = sshll.u32 %s341_s10, 4  ;;  %s277_s22 = int_to_ptr.vmem [resolvable:$false] %s276_s22 }
  0x39   : > { %s278_s23 = scalar_lea.vmem %s277_s22, 256  ;;  %p279_p12 = scmp.lt.s32.totalorder %s437_s11, %s277_s22 }
  0x3a   : > { %p274_p9 = pnand %p273_p5, %p494_p6  ;;  %p280_p2 = scmp.lt.s32.totalorder %s278_s23, %s272_s21 }
  0x3c   : > { %p275_p10 = pneg %p274_p9  ;;  %p281_p3 = por %p280_p2, %p279_p12 }
  0x3e   : > { %p282_p4 = pnand %p281_p3, %p275_p10 }
  0x40   : > { %285 = shalt.err (!%p282_p4)
}
  0x41   : > { %s286_s24 = scalar_lea.hbm %s442_s19, 128  ;;  %s290_s27 = scalar_lea.hbm %s483_s1, 256 }
  0x42   : > { %p287_p7 = scmp.ne.s32.totalorder %s442_s19, %s286_s24  ;;  %p291_p13 = scmp.lt.u32.totalorder %s442_s19, %s483_s1 }
  0x43   : > { %p292_p1 = scmp.lt.u32.totalorder %s290_s27, %s286_s24  ;;  %p294_p5 = scmp.lt.u32.totalorder %s286_s24, %s442_s19 }
  0x44   : > { %p288_p8 = pnand %p287_p7, %p494_p6 }
  0x45   : > { %p293_p0 = por %p292_p1, %p291_p13 }
  0x46   : > { %p289_p11 = pneg %p288_p8 }
  0x47   : > { %p295_p9 = por %p294_p5, %p293_p0 }
  0x49   : > { %p296_p10 = pnand %p295_p9, %p289_p11 }
  0x4b   : > { %299 = shalt.err (!%p296_p10)
}
  0x4c   : > { %198 = dma.vmem_to_hbm [thread:$0]  (%p494_p6), %s437_s11, 128, %s442_s19, %s112_s20  }
  0x4d PF: > { %p210_p12 = scmp.ge.s32.totalorder %s338_s9, 2  ;;  %s137_s30 = sand.u32 1, %s326_s6  }
  0x4e   : > { %p495_p2 = scmp.ne.s32.totalorder %s488_s17, 0  ;;  %s138_s2 = scalar_lea.sflag [#allocation4], %s137_s30 }
  0x50   : > { %p205_p3 = pnand %p210_p12, %p495_p2 }
  0x52   : > { %321 = dma.done.wait (!%p205_p3), %s138_s2, 128  }
  0x53   : > { %323 = vsyncadd (!%p205_p3), %s138_s2, 4294967168  ;;  %p12_p4 = scmp.ge.s32.totalorder %s377_s12, 4   ;;  %s496_s6 = smov %s330_s7 }
  0x54   : > { %s497_s7 = smov %s334_s8  ;;  %s498_s8 = smov %s388_s15 }
  0x55   : > { %s499_s9 = smov %s377_s12  ;;  %14 = sbr.rel (!%p12_p4) target bundleno = 4 (0x4), region = 61 }
  0x5c   :  { %143 = vsyncpa [#allocation3], 1 }
  0x5d   :  { %145 = vsyncpa [#allocation3 + $0x1], 1 }
  0x5e   :  { %146 = vsyncpa [#allocation4], 1 }
  0x5f   :  { %148 = vsyncpa [#allocation4 + $0x1], 1 }

// kernel: transformer_forward.12
= control target key start
LH: loop header
LB: loop body
LE: loop exit
PB: predicated region body
PF: predicated region fallthrough
CT: control target
= control target key end

     0   :  { %s700_s24 = smov 0   ;;  %s702_s25 = smov 0   ;;  %s775_s0 = inlined_call_operand.vmem [shape: bf16[16,32], index: 0, kind: input, shape index: {}]   ;;  %s776_s1 = inlined_call_operand.vmem [shape: bf16[32,64], index: 1, kind: input, shape index: {}]   ;;  %s777_s2 = inlined_call_operand.vmem [shape: f32[1,64], index: 2, kind: input, shape index: {}]   ;;  %s778_s3 = inlined_call_operand.vmem [shape: bf16[64,32], index: 3, kind: input, shape index: {}]   ;;  %s779_s4 = inlined_call_operand.vmem [shape: f32[1,32], index: 4, kind: input, shape index: {}]   ;;  %s780_s5 = inlined_call_operand.vmem [shape: f32[1,32], index: 5, kind: input, shape index: {}]   ;;  %s781_s6 = inlined_call_operand.vmem [shape: f32[1,32], index: 6, kind: input, shape index: {}]   ;;  %s782_s7 = inlined_call_operand.vmem [shape: bf16[16,32], index: 7, kind: output, shape index: {}]  }
   0x1   :  { %s704_s26 = smov 0  }
   0x2 LB: > { %s29_s27 = sadd.s32 1, %s652_s25  ;;  %p555_p0 = scmp.ge.s32.totalorder %s656_s26, 1  ;;  %s656_s26 = sphi %s704_s26, %s17_s26   ;;  %s652_s25 = sphi %s702_s25, %s784_s25   ;;  %s648_s24 = sphi %s700_s24, %s783_s24  }
   0x3   : > { %p31_p1 = scmp.ge.s32.totalorder %s29_s27, 2  ;;  %p248_p2 = scmp.lt.s32.totalorder %s656_s26, 3 }
   0x5   : > { %s786_s27 = smov (%p31_p1, %s29_s27), 0  ;;  %p249_p3 = pnand %p555_p0, %p248_p2 }
   0x6   : > { %v626_v0 = vld [vmem:[%s776_s1] sm:$0xff] (!%p249_p3)   ;;  %v658_v1 = vmov (!%p249_p3), 0.0   ;;  %v627_v2 = vld [vmem:[%s776_s1 + $0x8] sm:$0xff] (!%p249_p3)   ;;  %vm659_vm0 = vmmov (!%p249_p3), 0   ;;  %p278_p4 = scmp.lt.s32.totalorder (!%p249_p3), %s648_s24, 1  ;;  %vm291_vm1 = vcmask (!%p249_p3), 261120  }
   0x7   : > { %252 = sbr.rel (%p249_p3) target bundleno = 778 (0x30a), region = 48  ;;  %580 = vmatprep.subr.bf16.mxu0 (!%p249_p3), %v658_v1  ;;  %588 = vmatprep.subr.bf16.mxu1 (!%p249_p3), %v658_v1  ;;  %292 = vst.msk [vmem:[#allocation2] sm:$0xff] (!%p249_p3), %vm291_vm1, %v658_v1  ;;  %v628_v3 = vld [vmem:[%s778_s3] sm:$0xff] (!%p249_p3)   ;;  %v629_v4 = vld [vmem:[%s778_s3 + $0x8] sm:$0xff] (!%p249_p3)   ;;  %v630_v6 = vld [vmem:[%s778_s3 + $0x10] sm:$0xff] (!%p249_p3)   ;;  %vm396_vm2 = vcmask (!%p249_p3), 523264  }
   0x8   : > { %581 = vmatpush3.bf16.msra.mxu0 (!%p249_p3), %v626_v0  ;;  %584 = vmatprep.mubr.msk.bf16.mxu0 (!%p249_p3), %vm659_vm0, %v658_v1  ;;  %v631_v7 = vld [vmem:[%s778_s3 + $0x18] sm:$0xff] (!%p249_p3)   ;;  %v558_v8 = vld [vmem:[%s777_s2] ss:$0 sm:$0xff] (!%p249_p3)  ;;  %vm488_vm3 = vcmask (!%p249_p3), 257024  }
   0x9   : > { %582 = vmatprep.subr.bf16.mxu0 (!%p249_p3), %v658_v1  ;;  %596 = vmatprep.mubr.msk.bf16.mxu1 (!%p249_p3), %vm659_vm0, %v658_v1  ;;  %v567_v25 = vld [vmem:[%s779_s4] ss:$0 sm:$0xff] (!%p249_p3) }
   0xa   : > { %589 = vmatpush3.bf16.msra.mxu1 (!%p249_p3), %v628_v3  ;;  %v568_v38 = vld [vmem:[%s780_s5] ss:$0 sm:$0xff] (!%p249_p3) }
   0xb   : > { %590 = vmatprep.subr.bf16.mxu1 (!%p249_p3), %v658_v1  ;;  %v569_v40 = vld [vmem:[%s781_s6] ss:$0 sm:$0xff] (!%p249_p3) }
   0xc   : > { %583 = vmatpush3.bf16.msra.mxu0 (!%p249_p3), %v627_v2 }
   0xe   : > { %s788_s24 = smov (!%p278_p4, %s648_s24), 1  ;;  %591 = vmatpush3.bf16.msra.mxu1 %v629_v4  ;;  %v362_v16 = vld [vmem:[#allocation2] sm:$0xff] }
   0xf   : > { %s556_s13 = sshll.u32 %s788_s24, 2  ;;  %592 = vmatprep.subr.bf16.mxu1 %v658_v1 }
  0x10   : > { %s281_s16 = scalar_lea.vmem %s775_s0, %s556_s13  ;;  %s285_s12 = scalar_lea.vmem %s782_s7, %s556_s13 }
  0x11   : > { %v293_v5 = vld [vmem:[%s281_s16] sm:$0xf] }
  0x12   : > { %585 = vmatmul.mubr.msk.bf16.vlgmr.msra.gmra.mrb[0].mxu0 %vm291_vm1, %v293_v5  ;;  %593 = vmatpush3.bf16.msra.mxu1 %v630_v6  ;;  %v445_v22 = vld [vmem:[%s281_s16] sm:$0xf] }
  0x13   : > { %594 = vmatprep.subr.bf16.mxu1 %v658_v1  ;;  %v446_v23 = vunpack.c.l.bf16 %v445_v22 }
  0x16   : > { %595 = vmatpush3.bf16.msra.mxu1 %v631_v7 }
  0xe5   : > { %v355_v9 = vpop.f32.mrb[0].mxu0 }
  0xe6   : > { %v356_v10 = vadd.f32 %v558_v8, %v355_v9  ;;  %v586_v11 = vpop.f32.mrb[1].mxu0 }
  0xe7   : > { %v358_v12 = vpop.f32.mrb[2].mxu0 }
  0xe8   : > { %v361_v13 = vmax.f32 %v356_v10, 0.0  ;;  %v587_v14 = vpop.f32.mrb[3].mxu0 }
  0xea   : > { %v363_v15 = vpack.c.bf16 %v361_v13, %v361_v13 }
  0xec   : > { %597 = vmatmul.mubr.msk.bf16.vlgmr.msra.gmra.mrb[0].mxu1 %vm396_vm2, %v363_v15 }
 0x1bf   : > { %v434_v17 = vpop.f32.mrb[0].mxu1 }
 0x1c0   : > { %v440_v18 = vadd.f32 %v434_v17, %v362_v16  ;;  %v598_v19 = vpop.f32.mrb[1].mxu1 }
 0x1c1   : > { %v437_v20 = vpop.f32.mrb[2].mxu1 }
 0x1c2   : > { %441 = vst.msk [vmem:[#allocation2] sm:$0xff] %vm291_vm1, %v440_v18  ;;  %v599_v21 = vpop.f32.mrb[3].mxu1 }
 0x1c9   : > { %v447_v24 = vld [vmem:[#allocation2] sm:$0xff] }
 0x1ca   : > { %v448_v26 = vadd.f32 %v447_v24, %v446_v23 }
 0x1cc   : > { %v456_v27 = vadd.f32 %v567_v25, %v448_v26 }
 0x1ce   : > { %v457_v28 = vsel %vm291_vm1, %v456_v27, 0.0 }
 0x1cf   : > { %458 = vadd.xlane.f32.xlu0 %v457_v28 }
 0x25c   : > { %v459_v29 = vpop.xlane.xlu0 %458 }
 0x25d   : > { %v461_v30 = vmul.f32 0.03125, %v459_v29 }
 0x25f   : > { %v462_v31 = vsub.f32 %v456_v27, %v461_v30 }
 0x261   : > { %v463_v32 = vmul.f32 %v462_v31, %v462_v31 }
 0x263   : > { %v464_v33 = vsel %vm291_vm1, %v463_v32, 0.0 }
 0x264   : > { %465 = vadd.xlane.f32.xlu0 %v464_v33 }
 0x2f1   : > { %v466_v34 = vpop.xlane.xlu0 %465 }
 0x2f2   : > { %v467_v35 = vmul.f32 0.03125, %v466_v34 }
 0x2f4   : > { %v468_v36 = vadd.f32 1e-05, %v467_v35 }
 0x2f6   : > { %632 = vrsqrt.f32 %v468_v36 }
 0x300   : > { %v633_v37 = vpop.eup %632 }
 0x301   : > { %v470_v39 = vmul.f32 %v633_v37, %v462_v31 }
 0x303   : > { %v478_v41 = vmul.f32 %v568_v38, %v470_v39 }
 0x305   : > { %v486_v42 = vadd.f32 %v569_v40, %v478_v41 }
 0x307   : > { %v487_v43 = vpack.c.bf16 %v486_v42, %v486_v42 }
 0x309   : > { %489 = vst.msk [vmem:[%s285_s12] sm:$0xf] %vm488_vm3, %v487_v43 }
 0x30a PF: > { %s17_s26 = sadd.s32 1, %s656_s26   ;;  %s783_s24 = smov %s652_s25 }
 0x30b   : > { %p14_p5 = scmp.ge.s32.totalorder %s17_s26, 4   ;;  %s784_s25 = smov %s786_s27 }
 0x30d   :  { %16 = sbr.rel (!%p14_p5) target bundleno = 2 (0x2), region = 86 }

// kernel: transformer_forward.21
= control target key start
LH: loop header
LB: loop body
LE: loop exit
PB: predicated region body
PF: predicated region fallthrough
CT: control target
= control target key end

     0   :  { %8 = vsyncpa [#allocation4], 0  ;;  %s763_s0 = inlined_call_operand.vmem [shape: bf16[16,32], index: 0, kind: input, shape index: {}]   ;;  %s764_s1 = inlined_call_operand.vmem [shape: bf16[32,16], index: 1, kind: input, shape index: {}]   ;;  %s765_s2 = inlined_call_operand.vmem [shape: f32[1,16], index: 2, kind: input, shape index: {}]   ;;  %s766_s3 = inlined_call_operand.hbm [shape: f32[16,16], index: 3, kind: output, shape index: {}]  }
   0x1   :  { %10 = vsyncpa [#allocation4 + $0x1], 0  ;;  %s639_s12 = smov 0   ;;  %s641_s13 = smov 0  }
   0x2   :  { %s643_s14 = smov 0   ;;  %s645_s15 = smov 0  }
   0x3   :  { %s647_s16 = smov 0   ;;  %s649_s17 = smov 0  }
   0x4 LB: > { %s449_s18 = sadd.s32 4294967295, %s614_s17   ;;  %s450_s19 = sadd.s32 4294967294, %s614_s17   ;;  %s614_s17 = sphi %s649_s17, %s16_s17   ;;  %s610_s16 = sphi %s647_s16, %s773_s16   ;;  %s606_s15 = sphi %s645_s15, %s772_s15   ;;  %s602_s14 = sphi %s643_s14, %s771_s14   ;;  %s598_s13 = sphi %s641_s13, %s770_s13   ;;  %s594_s12 = sphi %s639_s12, %s769_s12  }
   0x5   : > { %s35_s20 = sadd.s32 1, %s610_s16  ;;  %s126_s21 = sadd.s32 1, %s602_s14 }
   0x6   : > { %p37_p0 = scmp.ge.s32.totalorder %s35_s20, 2  ;;  %p136_p1 = scmp.ne.s32.totalorder %s602_s14, %s598_s13 }
   0x7   : > { %p137_p2 = scmp.eq.s32.totalorder %s449_s18, 1  ;;  %p142_p3 = scmp.ne.s32.totalorder %s598_s13, %s594_s12 }
   0x8   : > { %s775_s20 = smov (%p37_p0, %s35_s20), 0  ;;  %p143_p5 = scmp.eq.s32.totalorder %s450_s19, 1 }
   0x9   : > { %p679_p4 = por %p137_p2, %p136_p1  ;;  %s121_s23 = ssub.s32 %s610_s16, %s775_s20 }
   0xa   : > { %p455_p6 = scmp.ge.s32.totalorder %s614_s17, 1  ;;  %p124_p7 = scmp.eq.s32.totalorder %s121_s23, 0 }
   0xb   : > { %p686_p8 = por %p143_p5, %p142_p3  ;;  %p189_p9 = scmp.lt.s32.totalorder %s614_s17, 3 }
   0xc   : > { %s692_s25 = scalar_select %p124_p7, %s602_s14, %s126_s21  }
   0xd   : > { %p190_p10 = pnand %p455_p6, %p189_p9 }
   0xe   : > { %v534_v0 = vld [vmem:[%s764_s1] sm:$0xff] (!%p190_p10)   ;;  %v616_v1 = vmov (!%p190_p10), 0.0   ;;  %v535_v2 = vld [vmem:[%s764_s1 + $0x8] sm:$0xff] (!%p190_p10)   ;;  %vm617_vm0 = vmmov (!%p190_p10), 0   ;;  %p226_p11 = scmp.lt.s32.totalorder (!%p190_p10), %s606_s15, 1  ;;  %vm250_vm1 = vcmask (!%p190_p10), 130048  }
   0xf   : > { %193 = sbr.rel (%p190_p10) target bundleno = 265 (0x109), region = 32  ;;  %469 = vmatprep.subr.bf16.mxu0 (!%p190_p10), %v616_v1  ;;  %473 = vmatprep.mubr.msk.bf16.mxu0 (!%p190_p10), %vm617_vm0, %v616_v1  ;;  %251 = vst.msk [vmem:[#allocation2] sm:$0xff] (!%p190_p10), %vm250_vm1, %v616_v1  ;;  %vm270_vm2 = vcmask (!%p190_p10), 261120   ;;  %s223_s8 = sand.u32 (!%p190_p10), 1, %s598_s13   ;;  %v461_v10 = vld [vmem:[%s765_s2] ss:$0 sm:$0xff] (!%p190_p10) }
  0x10   : > { %470 = vmatpush3.bf16.msra.mxu0 (!%p190_p10), %v534_v0  ;;  %s456_s9 = sshll.u32 (!%p190_p10), %s223_s8, 3  ;;  %s463_s18 = sshll.u32 (!%p190_p10), %s606_s15, 7 }
  0x11   : > { %471 = vmatprep.subr.bf16.mxu0 (!%p190_p10), %v616_v1  ;;  %s225_s19 = scalar_lea.vmem (!%p190_p10), [#allocation3], %s456_s9  ;;  %s715_s27 = scalar_lea.hbm (!%p190_p10), %s766_s3, %s463_s18 }
  0x12   : > { %s345_s21 = sshll.u32 (!%p190_p10), %s225_s19, 4  ;;  %s331_s28 = scalar_lea.sflag (!%p190_p10), [#allocation4], %s223_s8  ;;  %s717_s21 = int_to_ptr.vmem [resolvable:$true] %s345_s21 }
  0x13   : > { %s536_s29 = scalar_lea.vmem (!%p190_p10), %s717_s21, 128 }
  0x14   : > { %472 = vmatpush3.bf16.msra.mxu0 (!%p190_p10), %v535_v2  ;;  %p537_p12 = scmp.ne.s32.totalorder (!%p190_p10), %s717_s21, %s536_s29 }
  0x16   : > { %s227_s30 = scalar_select %p226_p11, %s606_s15, 1  ;;  %v252_v4 = vld [vmem:[#allocation2] sm:$0xff] }
  0x17   : > { %p538_p13 = pnand %p537_p12, %p679_p4  ;;  %s618_s15 = smov [#allocation3]  }
  0x18   : > { %s457_s4 = sshll.u32 %s227_s30, 2  ;;  %s540_s30 = sshll.u32 %s618_s15, 4  ;;  %s541_s30 = int_to_ptr.vmem [resolvable:$false] %s540_s30 }
  0x19   : > { %s232_s7 = scalar_lea.vmem %s763_s0, %s457_s4  ;;  %p539_p0 = pneg %p538_p13 }
  0x1a   : > { %v253_v3 = vld [vmem:[%s232_s7] sm:$0xf]  ;;  %s542_s4 = scalar_lea.vmem %s541_s30, 256  ;;  %p543_p1 = scmp.lt.s32.totalorder %s717_s21, %s541_s30 }
  0x1b   : > { %474 = vmatmul.mubr.msk.bf16.vlgmr.msra.gmra.mrb[0].mxu0 %vm270_vm2, %v253_v3  ;;  %p544_p2 = scmp.lt.s32.totalorder %s542_s4, %s536_s29 }
  0x1d   : > { %p545_p3 = por %p544_p2, %p543_p1 }
  0x1f   : > { %p546_p5 = pnand %p545_p3, %p539_p0 }
  0xee   : > { %v308_v5 = vpop.f32.mrb[0].mxu0 }
  0xef   : > { %v314_v6 = vadd.f32 %v308_v5, %v252_v4  ;;  %v475_v7 = vpop.f32.mrb[1].mxu0 }
  0xf0   : > { %v311_v8 = vpop.f32.mrb[2].mxu0 }
  0xf1   : > { %316 = vst.msk [vmem:[#allocation2] sm:$0xff] %vm250_vm1, %v314_v6  ;;  %v476_v9 = vpop.f32.mrb[3].mxu0 }
  0xf8   : > { %v320_v11 = vld [vmem:[#allocation2] sm:$0xff] }
  0xf9   : > { %v328_v12 = vadd.f32 %v461_v10, %v320_v11 }
  0xfb   : > { %329 = vst.msk [vmem:[%s225_s19] sm:$0xff] %vm250_vm1, %v328_v12 }
  0xfc   : > { %549 = shalt.err (!%p546_p5)
}
  0xfd   : > { %s550_s5 = scalar_lea.hbm %s715_s27, 128  ;;  %s554_s8 = scalar_lea.hbm %s766_s3, 256 }
  0xfe   : > { %p551_p6 = scmp.ne.s32.totalorder %s715_s27, %s550_s5  ;;  %p555_p10 = scmp.lt.u32.totalorder %s715_s27, %s766_s3 }
  0xff   : > { %p556_p11 = scmp.lt.u32.totalorder %s554_s8, %s550_s5  ;;  %p558_p13 = scmp.lt.u32.totalorder %s550_s5, %s715_s27 }
 0x100   : > { %p552_p7 = pnand %p551_p6, %p679_p4 }
 0x101   : > { %p557_p12 = por %p556_p11, %p555_p10 }
 0x102   : > { %p553_p9 = pneg %p552_p7 }
 0x103   : > { %p559_p0 = por %p558_p13, %p557_p12 }
 0x105   : > { %p560_p1 = pnand %p559_p0, %p553_p9 }
 0x107   : > { %563 = shalt.err (!%p560_p1)
}
 0x108   : > { %477 = dma.vmem_to_hbm [thread:$0]  (%p679_p4), %s717_s21, 128, %s715_s27, %s331_s28  }
 0x109 PF: > { %p483_p2 = scmp.ge.s32.totalorder %s614_s17, 2  ;;  %s357_s11 = sand.u32 1, %s594_s12  }
 0x10a   : > { %s358_s18 = scalar_lea.sflag [#allocation4], %s357_s11 }
 0x10b   : > { %p480_p3 = pnand %p483_p2, %p686_p8 }
 0x10d   : > { %589 = dma.done.wait (!%p480_p3), %s358_s18, 128  }
 0x10e   : > { %591 = vsyncadd (!%p480_p3), %s358_s18, 4294967168  ;;  %s16_s17 = sadd.s32 1, %s614_s17   ;;  %s769_s12 = smov %s598_s13 }
 0x10f   : > { %p13_p5 = scmp.ge.s32.totalorder %s16_s17, 4   ;;  %s770_s13 = smov %s602_s14 }
 0x110   : > { %s771_s14 = smov %s692_s25  ;;  %s772_s15 = smov %s610_s16 }
 0x111   : > { %s773_s16 = smov %s775_s20  ;;  %15 = sbr.rel (!%p13_p5) target bundleno = 4 (0x4), region = 81 }
 0x118   :  { %363 = vsyncpa [#allocation4], 1 }
 0x119   :  { %365 = vsyncpa [#allocation4 + $0x1], 1 }

// kernel: transformer_forward.11
= control target key start
LH: loop header
LB: loop body
LE: loop exit
PB: predicated region body
PF: predicated region fallthrough
CT: control target
= control target key end

     0   :  { %s1534_s17 = smov 0   ;;  %s1536_s18 = smov 0   ;;  %s1696_s0 = inlined_call_operand.vmem [shape: bf16[2,8,32], index: 0, kind: input, shape index: {}, may-alias: {0,1}]   ;;  %s1697_s1 = inlined_call_operand.vmem [shape: bf16[2,8,32], index: 1, kind: input, shape index: {}, may-alias: {0,1}]   ;;  %s1698_s2 = inlined_call_operand.vmem [shape: f32[2,1,8], index: 2, kind: input, shape index: {}]   ;;  %s1699_s3 = inlined_call_operand.vmem [shape: bf16[32,32], index: 3, kind: input, shape index: {}]   ;;  %s1700_s4 = inlined_call_operand.vmem [shape: f32[1,32], index: 4, kind: input, shape index: {}]   ;;  %s1701_s5 = inlined_call_operand.vmem [shape: bf16[32,64], index: 5, kind: input, shape index: {}]   ;;  %s1702_s6 = inlined_call_operand.vmem [shape: f32[1,64], index: 6, kind: input, shape index: {}]   ;;  %s1703_s7 = inlined_call_operand.vmem [shape: bf16[32,32], index: 7, kind: input, shape index: {}]   ;;  %s1704_s8 = inlined_call_operand.vmem [shape: f32[1,32], index: 8, kind: input, shape index: {}]   ;;  %s1705_s9 = inlined_call_operand.vmem [shape: f32[1,32], index: 9, kind: input, shape index: {}]   ;;  %s1706_s10 = inlined_call_operand.vmem [shape: f32[1,32], index: 10, kind: input, shape index: {}]   ;;  %s1707_s11 = inlined_call_operand.vmem [shape: bf16[2,8,32], index: 11, kind: output, shape index: {}]  }
   0x1   :  { %s1538_s19 = smov 0  }
   0x2 LB: > { %s33_s20 = sadd.s32 1, %s1456_s18  ;;  %p1253_p0 = scmp.ge.s32.totalorder %s1460_s19, 1  ;;  %s1460_s19 = sphi %s1538_s19, %s21_s19   ;;  %s1456_s18 = sphi %s1536_s18, %s1709_s18   ;;  %s1452_s17 = sphi %s1534_s17, %s1708_s17  }
   0x3   : > { %p35_p1 = scmp.ge.s32.totalorder %s33_s20, 2  ;;  %p372_p2 = scmp.lt.s32.totalorder %s1460_s19, 3 }
   0x5   : > { %s1711_s20 = smov (%p35_p1, %s33_s20), 0  ;;  %p373_p3 = pnand %p1253_p0, %p372_p2 }
   0x6   : > { %v1414_v0 = vld [vmem:[%s1701_s5] sm:$0xff] (!%p373_p3)   ;;  %v1462_v1 = vmov (!%p373_p3), 0.0   ;;  %v1416_v3 = vld [vmem:[%s1701_s5 + $0x8] sm:$0xff] (!%p373_p3)   ;;  %vm1463_vm0 = vmmov (!%p373_p3), 0   ;;  %p423_p4 = scmp.lt.s32.totalorder (!%p373_p3), %s1452_s17, 1  ;;  %vm473_vm1 = vcmask (!%p373_p3), 261120   ;;  %v587_v32 = vlaneseq (!%p373_p3) }
   0x7   : > { %376 = sbr.rel (%p373_p3) target bundleno = 1774 (0x6ee), region = 64  ;;  %1314 = vmatprep.subr.bf16.mxu1 (!%p373_p3), %v1462_v1  ;;  %1306 = vmatprep.subr.bf16.mxu0 (!%p373_p3), %v1462_v1  ;;  %v1415_v2 = vld [vmem:[%s1699_s3] sm:$0xff] (!%p373_p3)   ;;  %v1417_v4 = vld [vmem:[%s1699_s3 + $0x8] sm:$0xff] (!%p373_p3)   ;;  %vm592_vm2 = vcmask (!%p373_p3), 64512   ;;  %s1464_s25 = smov (!%p373_p3), 112   ;;  %vm657_vm4 = vcmask (!%p373_p3), 1043456  }
   0x8   : > { %1315 = vmatpush3.bf16.msra.mxu1 (!%p373_p3), %v1414_v0  ;;  %1318 = vmatprep.mubr.msk.bf16.mxu1 (!%p373_p3), %vm1463_vm0, %v1462_v1  ;;  %v1261_v7 = vld [vmem:[%s1702_s6] ss:$0 sm:$0xff] (!%p373_p3)  ;;  %s1465_s26 = smov (!%p373_p3), 120   ;;  %s1466_s27 = smov (!%p373_p3), 104   ;;  %v588_v34 = vshrl.u32 (!%p373_p3), %v587_v32, 7  ;;  %vm1048_vm5 = vcmask (!%p373_p3), 130048  }
   0x9   : > { %1307 = vmatpush3.bf16.msra.mxu0 (!%p373_p3), %v1415_v2  ;;  %1316 = vmatprep.subr.bf16.mxu1 (!%p373_p3), %v1462_v1  ;;  %v1257_v8 = vld [vmem:[%s1700_s4] ss:$0 sm:$0xff] (!%p373_p3)  ;;  %s1469_s14 = smov (!%p373_p3), 72   ;;  %s1470_s15 = smov (!%p373_p3), 88   ;;  %vm1051_vm6 = vcmask (!%p373_p3), 195584   ;;  %vm1152_vm7 = vcmask (!%p373_p3), 257024  }
   0xa   : > { %1308 = vmatprep.subr.bf16.mxu0 (!%p373_p3), %v1462_v1  ;;  %1310 = vmatprep.mubr.msk.bf16.mxu0 (!%p373_p3), %vm1463_vm0, %v1462_v1  ;;  %v589_v35 = vsub.s32 (!%p373_p3), 0, %v588_v34  ;;  %s1471_s24 = smov (!%p373_p3), 8  }
   0xc   : > { %1317 = vmatpush3.bf16.msra.mxu1 (!%p373_p3), %v1416_v3 }
   0xd   : > { %1309 = vmatpush3.bf16.msra.mxu0 (!%p373_p3), %v1417_v4  ;;  %1328 = vmatprep.subr.bf16.mxu1 (!%p373_p3), %v1462_v1 }
   0xe   : > { %s1713_s17 = smov (!%p423_p4, %s1452_s17), 1  ;;  %1322 = vmatprep.subr.bf16.mxu0 %v1462_v1 }
   0xf   : > { %s1575_s29 = sshll.u32 %s1713_s17, 2  ;;  %s436_s12 = scalar_lea.vmem %s1698_s2, %s1713_s17 }
  0x10   : > { %s433_s13 = scalar_lea.vmem %s1697_s1, %s1575_s29  ;;  %s429_s16 = scalar_lea.vmem %s1696_s0, %s1575_s29  ;;  %v447_v33 = vld [vmem:[%s436_s12] sm:$0x1] }
  0x11   : > { %v446_v5 = vld [vmem:[%s433_s13] sm:$0xf]  ;;  %vm448_vm3 = vcmp.eq.f32.partialorder %v447_v33, 0.0  ;;  %s1467_s17 = smov 96   ;;  %s1468_s13 = smov 80  }
  0x12   : > { %1319 = vmatmul.mubr.msk.bf16.vlgmr.msra.gmra.mrb[0].mxu1 %vm473_vm1, %v446_v5  ;;  %v1588_v6 = vld [vmem:[%s429_s16] sm:$0xf]  ;;  %v449_v36 = vsel %vm448_vm3, -1e+09, %v1462_v1  ;;  %s443_s16 = scalar_lea.vmem %s1707_s11, %s1575_s29 }
  0x13   : > { %1311 = vmatmul.mubr.msk.bf16.vlgmr.msra.gmra.mrb[0].mxu0 %vm473_vm1, %v1588_v6  ;;  %1330 = vmatprep.mubr.msk.bf16.mxu1 %vm1463_vm0, %v1462_v1  ;;  %v590_v37 = vrot.slane %v449_v36, %v589_v35 }
  0x14   : > { %1324 = vmatprep.mubr.msk.bf16.mxu0 %vm1463_vm0, %v1462_v1 }
  0xe5   : > { %v577_v9 = vpop.f32.mrb[0].mxu1 }
  0xe6   : > { %v578_v10 = vadd.f32 %v1261_v7, %v577_v9  ;;  %v1320_v11 = vpop.f32.mrb[1].mxu1  ;;  %v511_v12 = vpop.f32.mrb[0].mxu0 }
  0xe7   : > { %v512_v13 = vadd.f32 %v1257_v8, %v511_v12  ;;  %v580_v14 = vpop.f32.mrb[2].mxu1  ;;  %v1312_v15 = vpop.f32.mrb[1].mxu0 }
  0xe8   : > { %v1602_v16 = vpack.c.bf16 %v578_v10, %v578_v10  ;;  %v1321_v17 = vpop.f32.mrb[3].mxu1  ;;  %v514_v18 = vpop.f32.mrb[2].mxu0 }
  0xe9   : > { %v583_v19 = vmul.f32 0.35355338, %v512_v13  ;;  %v1313_v20 = vpop.f32.mrb[3].mxu0 }
  0xea   : > { %816 = vrot.lane.b32.xlu1 %v1602_v16, %s1464_s25  ;;  %705 = vrot.lane.b32.xlu0 %v1602_v16, %s1465_s26  ;;  %v597_v21 = vsel %vm592_vm2, %v1602_v16, 0 }
  0xeb   : > { %v584_v22 = vpack.c.bf16 %v583_v19, %v583_v19  ;;  %1323 = vmatpush3.bf16.xpose.msra.mxu0 %v597_v21 }
  0xec   : > { %1334 = vmatprep.subr.bf16.mxu0 %v1462_v1 }
  0xee   : > { %814 = vrot.lane.b32.xlu1 %v584_v22, %s1464_s25  ;;  %703 = vrot.lane.b32.xlu0 %v584_v22, %s1465_s26  ;;  %s1472_s25 = smov 16   ;;  %s1473_s26 = smov 24  }
  0xf2   : > { %925 = vrot.lane.b32.xlu1 %v584_v22, %s1466_s27  ;;  %927 = vrot.lane.b32.xlu0 %v1602_v16, %s1466_s27 }
  0xf3   : > { %1325 = vmatmul.mubr.msk.bf16.vlgmr.msra.gmra.mrb[4].mxu0 %vm592_vm2, %v584_v22 }
  0xf4   : > { %1336 = vmatprep.mubr.msk.bf16.mxu0 %vm1463_vm0, %v1462_v1 }
 0x15c   : > { %v706_v23 = vpop.permute.xlu0 %705  ;;  %v817_v25 = vpop.permute.xlu1 %816 }
 0x15d   : > { %v711_v24 = vsel %vm592_vm2, %v706_v23, 0  ;;  %v822_v27 = vsel %vm592_vm2, %v817_v25, 0 }
 0x15e   : > { %1335 = vmatpush3.bf16.xpose.msra.mxu0 %v711_v24 }
 0x15f   : > { %1346 = vmatprep.subr.bf16.mxu0 %v1462_v1 }
 0x160   : > { %v704_v26 = vpop.permute.xlu0 %703  ;;  %v815_v29 = vpop.permute.xlu1 %814 }
 0x164   : > { %v928_v28 = vpop.permute.xlu0 %927  ;;  %v926_v31 = vpop.permute.xlu1 %925 }
 0x165   : > { %1337 = vmatmul.mubr.msk.bf16.vlgmr.msra.gmra.mrb[8].mxu0 %vm592_vm2, %v704_v26  ;;  %v933_v30 = vsel %vm592_vm2, %v928_v28, 0 }
 0x166   : > { %1347 = vmatpush3.bf16.xpose.msra.mxu0 %v822_v27  ;;  %1348 = vmatprep.mubr.msk.bf16.mxu0 %vm1463_vm0, %v1462_v1 }
 0x167   : > { %1358 = vmatprep.subr.bf16.mxu0 %v1462_v1 }
 0x16d   : > { %1349 = vmatmul.mubr.msk.bf16.vlgmr.msra.gmra.mrb[12].mxu0 %vm592_vm2, %v815_v29 }
 0x16e   : > { %1359 = vmatpush3.bf16.xpose.msra.mxu0 %v933_v30  ;;  %1360 = vmatprep.mubr.msk.bf16.mxu0 %vm1463_vm0, %v1462_v1 }
 0x16f   : > { %1370 = vmatprep.subr.bf16.mxu0 %v1462_v1 }
 0x175   : > { %1361 = vmatmul.mubr.msk.bf16.vlgmr.msra.gmra.mrb[16].mxu0 %vm592_vm2, %v926_v31 }
 0x176   : > { %1374 = vmatprep.mubr.msk.bf16.mxu0 %vm1463_vm0, %v1462_v1 }
 0x1c6   : > { %v633_v38 = vpop.f32.mrb[4].mxu0 }
 0x1c7   : > { %v634_v39 = vadd.f32 %v633_v38, %v590_v37  ;;  %v1326_v40 = vpop.f32.mrb[5].mxu0 }
 0x1c8   : > { %v636_v41 = vpop.f32.mrb[6].mxu0 }
 0x1c9   : > { %v1327_v42 = vpop.f32.mrb[7].mxu0  ;;  %v639_v43 = vsel %vm592_vm2, %v634_v39, -inf }
 0x1ca   : > { %640 = vmax.xlane.f32.xlu0 %v639_v43 }
 0x238   : > { %v747_v44 = vpop.f32.mrb[8].mxu0 }
 0x239   : > { %v748_v45 = vadd.f32 %v747_v44, %v590_v37  ;;  %v1338_v46 = vpop.f32.mrb[9].mxu0 }
 0x23a   : > { %v750_v47 = vpop.f32.mrb[10].mxu0 }
 0x23b   : > { %v1339_v48 = vpop.f32.mrb[11].mxu0  ;;  %v753_v49 = vsel %vm592_vm2, %v748_v45, -inf }
 0x23c   : > { %754 = vmax.xlane.f32.xlu1 %v753_v49  ;;  %v1418_v48 = vld [vmem:[%s1703_s7] sm:$0xff]  }
 0x23d   : > { %1371 = vmatpush3.bf16.msra.mxu0 %v1418_v48 }
 0x23e   : > { %1372 = vmatprep.subr.bf16.mxu0 %v1462_v1 }
 0x240   : > { %v858_v50 = vpop.f32.mrb[12].mxu0 }
 0x241   : > { %v859_v51 = vadd.f32 %v858_v50, %v590_v37  ;;  %v1350_v52 = vpop.f32.mrb[13].mxu0  ;;  %v1419_v50 = vld [vmem:[%s1703_s7 + $0x8] sm:$0xff]  }
 0x242   : > { %v861_v53 = vpop.f32.mrb[14].mxu0  ;;  %1373 = vmatpush3.bf16.msra.mxu0 %v1419_v50 }
 0x243   : > { %v1351_v54 = vpop.f32.mrb[15].mxu0  ;;  %v864_v55 = vsel %vm592_vm2, %v859_v51, -inf }
 0x244   : > { %865 = vmax.xlane.f32.xlu0 %v864_v55 }
 0x248   : > { %v969_v56 = vpop.f32.mrb[16].mxu0 }
 0x249   : > { %v970_v57 = vadd.f32 %v969_v56, %v590_v37  ;;  %v1362_v58 = vpop.f32.mrb[17].mxu0 }
 0x24a   : > { %v972_v59 = vpop.f32.mrb[18].mxu0 }
 0x24b   : > { %v1363_v60 = vpop.f32.mrb[19].mxu0  ;;  %v975_v61 = vsel %vm592_vm2, %v970_v57, -inf }
 0x24c   : > { %976 = vmax.xlane.f32.xlu0 %v975_v61 }
 0x257   : > { %v641_v62 = vpop.xlane.xlu0 %640 }
 0x258   : > { %v642_v63 = vsub.f32 %v634_v39, %v641_v62 }
 0x25a   : > { %v643_v0 = vmul.f32 1.442695, %v642_v63 }
 0x25c   : > { %1420 = vpow2.f32 %v643_v0 }
 0x266   : > { %v1421_v2 = vpop.eup %1420 }
 0x267   : > { %v645_v3 = vsel %vm592_vm2, %v1421_v2, 0.0 }
 0x268   : > { %646 = vadd.xlane.f32.xlu1 %v645_v3 }
 0x279   : > { %652 = vrot.lane.b32.xlu1 %v1602_v16, %s1467_s17 }
 0x2c9   : > { %v755_v4 = vpop.xlane.xlu1 %754 }
 0x2ca   : > { %v756_v5 = vsub.f32 %v748_v45, %v755_v4 }
 0x2cc   : > { %v757_v7 = vmul.f32 1.442695, %v756_v5 }
 0x2ce   : > { %1422 = vpow2.f32 %v757_v7 }
 0x2d1   : > { %v866_v8 = vpop.xlane.xlu0 %865 }
 0x2d2   : > { %v867_v9 = vsub.f32 %v859_v51, %v866_v8 }
 0x2d4   : > { %v868_v10 = vmul.f32 1.442695, %v867_v9  ;;  %v1273_v9 = vld [vmem:[%s1704_s8] ss:$0 sm:$0xff] }
 0x2d6   : > { %1424 = vpow2.f32 %v868_v10  ;;  %v1119_v10 = vunpack.c.l.bf16 %v1588_v6 }
 0x2d8   : > { %v1423_v11 = vpop.eup %1422 }
 0x2d9   : > { %v977_v12 = vpop.xlane.xlu0 %976  ;;  %v759_v13 = vsel %vm592_vm2, %v1423_v11, 0.0 }
 0x2da   : > { %v978_v14 = vsub.f32 %v970_v57, %v977_v12  ;;  %760 = vadd.xlane.f32.xlu0 %v759_v13 }
 0x2dc   : > { %v979_v15 = vmul.f32 1.442695, %v978_v14 }
 0x2de   : > { %1426 = vpow2.f32 %v979_v15 }
 0x2e0   : > { %v1425_v17 = vpop.eup %1424 }
 0x2e1   : > { %v870_v18 = vsel %vm592_vm2, %v1425_v17, 0.0 }
 0x2e2   : > { %871 = vadd.xlane.f32.xlu1 %v870_v18 }
 0x2e8   : > { %v1427_v19 = vpop.eup %1426 }
 0x2e9   : > { %v981_v20 = vsel %vm592_vm2, %v1427_v19, 0.0 }
 0x2ea   : > { %982 = vadd.xlane.f32.xlu0 %v981_v20 }
 0x2f3   : > { %876 = vrot.lane.b32.xlu1 %v1602_v16, %s1468_s13 }
 0x2f5   : > { %v647_v21 = vpop.xlane.xlu1 %646 }
 0x2f6   : > { %1428 = vrcp.f32 %v647_v21 }
 0x2f7   : > { %987 = vrot.lane.b32.xlu1 %v1602_v16, %s1469_s14 }
 0x2f9   : > { %v653_v22 = vpop.permute.xlu1 %652 }
 0x2fa   : > { %v659_v23 = vsel %vm657_vm4, %v653_v22, 0 }
 0x2fb   : > { %1329 = vmatpush3.bf16.msra.mxu1 %v659_v23 }
 0x2fc   : > { %1340 = vmatprep.subr.bf16.mxu1 %v1462_v1 }
 0x300   : > { %v1429_v24 = vpop.eup %1428  ;;  %765 = vrot.lane.b32.xlu0 %v1602_v16, %s1470_s15 }
 0x301   : > { %v649_v25 = vmul.f32 %v1429_v24, %v1421_v2 }
 0x303   : > { %v650_v26 = vpack.c.bf16 %v649_v25, %v649_v25 }
 0x305   : > { %1331 = vmatmul.mubr.msk.bf16.vlgmr.msra.gmra.mrb[4].mxu1 %vm592_vm2, %v650_v26 }
 0x306   : > { %1342 = vmatprep.mubr.msk.bf16.mxu1 %vm1463_vm0, %v1462_v1 }
 0x367   : > { %v761_v27 = vpop.xlane.xlu0 %760 }
 0x368   : > { %1430 = vrcp.f32 %v761_v27  ;;  %v1277_v27 = vld [vmem:[%s1705_s9] ss:$0 sm:$0xff] }
 0x36f   : > { %v872_v28 = vpop.xlane.xlu1 %871 }
 0x370   : > { %1432 = vrcp.f32 %v872_v28 }
 0x372   : > { %v1431_v29 = vpop.eup %1430 }
 0x373   : > { %v763_v31 = vmul.f32 %v1431_v29, %v1423_v11  ;;  %v877_v34 = vpop.permute.xlu1 %876  ;;  %v1278_v29 = vld [vmem:[%s1706_s10] ss:$0 sm:$0xff] }
 0x374   : > { %v882_v36 = vsel %vm657_vm4, %v877_v34, 0 }
 0x375   : > { %v764_v16 = vpack.c.bf16 %v763_v31, %v763_v31 }
 0x377   : > { %v983_v30 = vpop.xlane.xlu0 %982  ;;  %v988_v38 = vpop.permute.xlu1 %987 }
 0x378   : > { %1434 = vrcp.f32 %v983_v30  ;;  %v993_v41 = vsel %vm657_vm4, %v988_v38, 0 }
 0x37a   : > { %v1433_v35 = vpop.eup %1432 }
 0x37b   : > { %v766_v32 = vpop.permute.xlu0 %765  ;;  %v874_v37 = vmul.f32 %v1433_v35, %v1425_v17 }
 0x37c   : > { %v771_v33 = vsel %vm657_vm4, %v766_v32, 0 }
 0x37d   : > { %1341 = vmatpush3.bf16.msra.mxu1 %v771_v33  ;;  %v875_v39 = vpack.c.bf16 %v874_v37, %v874_v37 }
 0x37e   : > { %1352 = vmatprep.subr.bf16.mxu1 %v1462_v1 }
 0x380   : > { %1343 = vmatmul.mubr.msk.bf16.vlgmr.msra.gmra.mrb[8].mxu1 %vm592_vm2, %v764_v16 }
 0x381   : > { %1353 = vmatpush3.bf16.msra.mxu1 %v882_v36  ;;  %1354 = vmatprep.mubr.msk.bf16.mxu1 %vm1463_vm0, %v1462_v1 }
 0x382   : > { %1364 = vmatprep.subr.bf16.mxu1 %v1462_v1  ;;  %v1435_v40 = vpop.eup %1434 }
 0x383   : > { %v985_v42 = vmul.f32 %v1435_v40, %v1427_v19 }
 0x385   : > { %v986_v43 = vpack.c.bf16 %v985_v42, %v985_v42 }
 0x388   : > { %1355 = vmatmul.mubr.msk.bf16.vlgmr.msra.gmra.mrb[12].mxu1 %vm592_vm2, %v875_v39 }
 0x389   : > { %1365 = vmatpush3.bf16.msra.mxu1 %v993_v41  ;;  %1366 = vmatprep.mubr.msk.bf16.mxu1 %vm1463_vm0, %v1462_v1 }
 0x390   : > { %1367 = vmatmul.mubr.msk.bf16.vlgmr.msra.gmra.mrb[16].mxu1 %vm592_vm2, %v986_v43 }
 0x3d8   : > { %v695_v44 = vpop.f32.mrb[4].mxu1 }
 0x3d9   : > { %v1332_v45 = vpop.f32.mrb[5].mxu1  ;;  %v701_v2 = vpack.c.bf16 %v695_v44, %v695_v44 }
 0x3da   : > { %v698_v46 = vpop.f32.mrb[6].mxu1 }
 0x3db   : > { %v1333_v47 = vpop.f32.mrb[7].mxu1 }
 0x453   : > { %v807_v49 = vpop.f32.mrb[8].mxu1 }
 0x454   : > { %v813_v51 = vpack.c.bf16 %v807_v49, %v807_v49  ;;  %v1344_v52 = vpop.f32.mrb[9].mxu1 }
 0x455   : > { %v810_v53 = vpop.f32.mrb[10].mxu1 }
 0x456   : > { %1037 = vrot.lane.b32.xlu0 %v813_v51, %s1471_s24  ;;  %v1345_v54 = vpop.f32.mrb[11].mxu1 }
 0x45b   : > { %v918_v55 = vpop.f32.mrb[12].mxu1 }
 0x45c   : > { %v924_v56 = vpack.c.bf16 %v918_v55, %v918_v55  ;;  %v1356_v57 = vpop.f32.mrb[13].mxu1 }
 0x45d   : > { %v921_v58 = vpop.f32.mrb[14].mxu1 }
 0x45e   : > { %1040 = vrot.lane.b32.xlu1 %v924_v56, %s1472_s25  ;;  %v1357_v59 = vpop.f32.mrb[15].mxu1 }
 0x463   : > { %v1029_v60 = vpop.f32.mrb[16].mxu1 }
 0x464   : > { %v1035_v61 = vpack.c.bf16 %v1029_v60, %v1029_v60  ;;  %v1368_v62 = vpop.f32.mrb[17].mxu1 }
 0x465   : > { %v1032_v63 = vpop.f32.mrb[18].mxu1 }
 0x466   : > { %1043 = vrot.lane.b32.xlu0 %v1035_v61, %s1473_s26  ;;  %v1369_v0 = vpop.f32.mrb[19].mxu1 }
 0x4c8   : > { %v1038_v1 = vpop.permute.xlu0 %1037 }
 0x4c9   : > { %v1047_v4 = vsel %vm592_vm2, %v701_v2, %v1038_v1 }
 0x4d0   : > { %v1041_v3 = vpop.permute.xlu1 %1040 }
 0x4d1   : > { %v1050_v5 = vsel %vm1048_vm5, %v1047_v4, %v1041_v3 }
 0x4d8   : > { %v1044_v7 = vpop.permute.xlu0 %1043 }
 0x4d9   : > { %v1053_v8 = vsel %vm1051_vm6, %v1050_v5, %v1044_v7 }
 0x4da   : > { %1375 = vmatmul.mubr.msk.bf16.vlgmr.msra.gmra.mrb[20].mxu0 %vm473_vm1, %v1053_v8 }
 0x5ad   : > { %v1113_v11 = vpop.f32.mrb[20].mxu0 }
 0x5ae   : > { %v1114_v12 = vadd.f32 %v1273_v9, %v1113_v11  ;;  %v1376_v13 = vpop.f32.mrb[21].mxu0 }
 0x5af   : > { %v1116_v14 = vpop.f32.mrb[22].mxu0 }
 0x5b0   : > { %v1377_v15 = vpop.f32.mrb[23].mxu0  ;;  %v1120_v17 = vadd.f32 %v1119_v10, %v1114_v12 }
 0x5b2   : > { %v1121_v18 = vsel %vm473_vm1, %v1120_v17, 0.0 }
 0x5b3   : > { %1122 = vadd.xlane.f32.xlu1 %v1121_v18 }
 0x640   : > { %v1123_v19 = vpop.xlane.xlu1 %1122 }
 0x641   : > { %v1125_v20 = vmul.f32 0.03125, %v1123_v19 }
 0x643   : > { %v1126_v21 = vsub.f32 %v1120_v17, %v1125_v20 }
 0x645   : > { %v1127_v22 = vmul.f32 %v1126_v21, %v1126_v21 }
 0x647   : > { %v1128_v23 = vsel %vm473_vm1, %v1127_v22, 0.0 }
 0x648   : > { %1129 = vadd.xlane.f32.xlu0 %v1128_v23 }
 0x6d5   : > { %v1130_v24 = vpop.xlane.xlu0 %1129 }
 0x6d6   : > { %v1131_v25 = vmul.f32 0.03125, %v1130_v24 }
 0x6d8   : > { %v1132_v6 = vadd.f32 1e-05, %v1131_v25 }
 0x6da   : > { %1436 = vrsqrt.f32 %v1132_v6 }
 0x6e4   : > { %v1437_v26 = vpop.eup %1436 }
 0x6e5   : > { %v1134_v28 = vmul.f32 %v1437_v26, %v1126_v21 }
 0x6e7   : > { %v1142_v30 = vmul.f32 %v1277_v27, %v1134_v28 }
 0x6e9   : > { %v1150_v31 = vadd.f32 %v1278_v29, %v1142_v30 }
 0x6eb   : > { %v1151_v32 = vpack.c.bf16 %v1150_v31, %v1150_v31 }
 0x6ed   : > { %1153 = vst.msk [vmem:[%s443_s16] sm:$0xf] %vm1152_vm7, %v1151_v32 }
 0x6ee PF: > { %s21_s19 = sadd.s32 1, %s1460_s19   ;;  %s1708_s17 = smov %s1456_s18 }
 0x6ef   : > { %p18_p5 = scmp.ge.s32.totalorder %s21_s19, 4   ;;  %s1709_s18 = smov %s1711_s20 }
 0x6f1   :  { %20 = sbr.rel (!%p18_p5) target bundleno = 2 (0x2), region = 100 }

// kernel: transformer_forward.15
= control target key start
LH: loop header
LB: loop body
LE: loop exit
PB: predicated region body
PF: predicated region fallthrough
CT: control target
= control target key end

     0   :  { %s1539_s17 = smov 0   ;;  %s1541_s18 = smov 0   ;;  %s1697_s0 = inlined_call_operand.vmem [shape: bf16[2,8,32], index: 0, kind: input, shape index: {}, may-alias: {0,1}]   ;;  %s1698_s1 = inlined_call_operand.vmem [shape: bf16[2,8,32], index: 1, kind: input, shape index: {}, may-alias: {0,1}]   ;;  %s1699_s2 = inlined_call_operand.vmem [shape: f32[1,8,8], index: 2, kind: input, shape index: {}]   ;;  %s1700_s3 = inlined_call_operand.vmem [shape: bf16[32,32], index: 3, kind: input, shape index: {}]   ;;  %s1701_s4 = inlined_call_operand.vmem [shape: f32[1,32], index: 4, kind: input, shape index: {}]   ;;  %s1702_s5 = inlined_call_operand.vmem [shape: bf16[32,64], index: 5, kind: input, shape index: {}]   ;;  %s1703_s6 = inlined_call_operand.vmem [shape: f32[1,64], index: 6, kind: input, shape index: {}]   ;;  %s1704_s7 = inlined_call_operand.vmem [shape: bf16[32,32], index: 7, kind: input, shape index: {}]   ;;  %s1705_s8 = inlined_call_operand.vmem [shape: f32[1,32], index: 8, kind: input, shape index: {}]   ;;  %s1706_s9 = inlined_call_operand.vmem [shape: f32[1,32], index: 9, kind: input, shape index: {}]   ;;  %s1707_s10 = inlined_call_operand.vmem [shape: f32[1,32], index: 10, kind: input, shape index: {}]   ;;  %s1708_s11 = inlined_call_operand.vmem [shape: bf16[2,8,32], index: 11, kind: output, shape index: {}]  }
   0x1   :  { %s1543_s19 = smov 0  }
   0x2 LB: > { %s33_s20 = sadd.s32 1, %s1461_s18  ;;  %p1258_p0 = scmp.ge.s32.totalorder %s1465_s19, 1  ;;  %s1465_s19 = sphi %s1543_s19, %s21_s19   ;;  %s1461_s18 = sphi %s1541_s18, %s1710_s18   ;;  %s1457_s17 = sphi %s1539_s17, %s1709_s17  }
   0x3   : > { %p35_p1 = scmp.ge.s32.totalorder %s33_s20, 2  ;;  %p373_p2 = scmp.lt.s32.totalorder %s1465_s19, 3 }
   0x5   : > { %s1712_s20 = smov (%p35_p1, %s33_s20), 0  ;;  %p374_p3 = pnand %p1258_p0, %p373_p2 }
   0x6   : > { %v1419_v0 = vld [vmem:[%s1702_s5] sm:$0xff] (!%p374_p3)   ;;  %v1467_v1 = vmov (!%p374_p3), 0.0   ;;  %v1421_v3 = vld [vmem:[%s1702_s5 + $0x8] sm:$0xff] (!%p374_p3)   ;;  %vm1468_vm0 = vmmov (!%p374_p3), 0   ;;  %p425_p4 = scmp.lt.s32.totalorder (!%p374_p3), %s1457_s17, 1  ;;  %vm476_vm1 = vcmask (!%p374_p3), 261120  }
   0x7   : > { %377 = sbr.rel (%p374_p3) target bundleno = 1774 (0x6ee), region = 64  ;;  %1319 = vmatprep.subr.bf16.mxu1 (!%p374_p3), %v1467_v1  ;;  %1311 = vmatprep.subr.bf16.mxu0 (!%p374_p3), %v1467_v1  ;;  %v1420_v2 = vld [vmem:[%s1700_s3] sm:$0xff] (!%p374_p3)   ;;  %v1422_v4 = vld [vmem:[%s1700_s3 + $0x8] sm:$0xff] (!%p374_p3)   ;;  %vm589_vm2 = vcmask (!%p374_p3), 64512   ;;  %s1469_s24 = smov (!%p374_p3), 112   ;;  %vm654_vm4 = vcmask (!%p374_p3), 1043456  }
   0x8   : > { %1320 = vmatpush3.bf16.msra.mxu1 (!%p374_p3), %v1419_v0  ;;  %1323 = vmatprep.mubr.msk.bf16.mxu1 (!%p374_p3), %vm1468_vm0, %v1467_v1  ;;  %v1266_v7 = vld [vmem:[%s1703_s6] ss:$0 sm:$0xff] (!%p374_p3)  ;;  %s1470_s25 = smov (!%p374_p3), 120   ;;  %s1471_s26 = smov (!%p374_p3), 104   ;;  %vm1045_vm5 = vcmask (!%p374_p3), 130048   ;;  %vm1048_vm6 = vcmask (!%p374_p3), 195584  }
   0x9   : > { %1312 = vmatpush3.bf16.msra.mxu0 (!%p374_p3), %v1420_v2  ;;  %1321 = vmatprep.subr.bf16.mxu1 (!%p374_p3), %v1467_v1  ;;  %v1262_v8 = vld [vmem:[%s1701_s4] ss:$0 sm:$0xff] (!%p374_p3)  ;;  %s1472_s30 = smov (!%p374_p3), 96   ;;  %s1473_s12 = smov (!%p374_p3), 80   ;;  %vm1149_vm7 = vcmask (!%p374_p3), 257024  }
   0xa   : > { %1313 = vmatprep.subr.bf16.mxu0 (!%p374_p3), %v1467_v1  ;;  %1315 = vmatprep.mubr.msk.bf16.mxu0 (!%p374_p3), %vm1468_vm0, %v1467_v1  ;;  %v450_v32 = vld [vmem:[%s1699_s2] sm:$0xff] (!%p374_p3)  ;;  %s1475_s14 = smov (!%p374_p3), 88   ;;  %s1476_s22 = smov (!%p374_p3), 8  }
   0xb   : > { %vm451_vm3 = vcmp.eq.f32.partialorder (!%p374_p3), %v450_v32, 0.0  ;;  %s1477_s23 = smov (!%p374_p3), 16  }
   0xc   : > { %1322 = vmatpush3.bf16.msra.mxu1 (!%p374_p3), %v1421_v3  ;;  %v452_v33 = vsel (!%p374_p3), %vm451_vm3, -1e+09, %v1467_v1 }
   0xd   : > { %1314 = vmatpush3.bf16.msra.mxu0 (!%p374_p3), %v1422_v4  ;;  %1333 = vmatprep.subr.bf16.mxu1 (!%p374_p3), %v1467_v1 }
   0xe   : > { %s1714_s17 = smov (!%p425_p4, %s1457_s17), 1  ;;  %1327 = vmatprep.subr.bf16.mxu0 %v1467_v1 }
   0xf   : > { %s1577_s29 = sshll.u32 %s1714_s17, 2 }
  0x10   : > { %s435_s13 = scalar_lea.vmem %s1698_s1, %s1577_s29  ;;  %s431_s16 = scalar_lea.vmem %s1697_s0, %s1577_s29 }
  0x11   : > { %v449_v5 = vld [vmem:[%s435_s13] sm:$0xf]  ;;  %s1474_s13 = smov 72   ;;  %s446_s15 = scalar_lea.vmem %s1708_s11, %s1577_s29 }
  0x12   : > { %1324 = vmatmul.mubr.msk.bf16.vlgmr.msra.gmra.mrb[0].mxu1 %vm476_vm1, %v449_v5  ;;  %v1590_v6 = vld [vmem:[%s431_s16] sm:$0xf] }
  0x13   : > { %1316 = vmatmul.mubr.msk.bf16.vlgmr.msra.gmra.mrb[0].mxu0 %vm476_vm1, %v1590_v6  ;;  %1335 = vmatprep.mubr.msk.bf16.mxu1 %vm1468_vm0, %v1467_v1 }
  0x14   : > { %1329 = vmatprep.mubr.msk.bf16.mxu0 %vm1468_vm0, %v1467_v1 }
  0xe5   : > { %v580_v9 = vpop.f32.mrb[0].mxu1 }
  0xe6   : > { %v581_v10 = vadd.f32 %v1266_v7, %v580_v9  ;;  %v1325_v11 = vpop.f32.mrb[1].mxu1  ;;  %v514_v12 = vpop.f32.mrb[0].mxu0 }
  0xe7   : > { %v515_v13 = vadd.f32 %v1262_v8, %v514_v12  ;;  %v583_v14 = vpop.f32.mrb[2].mxu1  ;;  %v1317_v15 = vpop.f32.mrb[1].mxu0 }
  0xe8   : > { %v1604_v16 = vpack.c.bf16 %v581_v10, %v581_v10  ;;  %v1326_v17 = vpop.f32.mrb[3].mxu1  ;;  %v517_v18 = vpop.f32.mrb[2].mxu0 }
  0xe9   : > { %v586_v19 = vmul.f32 0.35355338, %v515_v13  ;;  %v1318_v20 = vpop.f32.mrb[3].mxu0 }
  0xea   : > { %813 = vrot.lane.b32.xlu1 %v1604_v16, %s1469_s24  ;;  %702 = vrot.lane.b32.xlu0 %v1604_v16, %s1470_s25  ;;  %v594_v21 = vsel %vm589_vm2, %v1604_v16, 0 }
  0xeb   : > { %v587_v22 = vpack.c.bf16 %v586_v19, %v586_v19  ;;  %1328 = vmatpush3.bf16.xpose.msra.mxu0 %v594_v21 }
  0xec   : > { %1339 = vmatprep.subr.bf16.mxu0 %v1467_v1 }
  0xee   : > { %811 = vrot.lane.b32.xlu1 %v587_v22, %s1469_s24  ;;  %700 = vrot.lane.b32.xlu0 %v587_v22, %s1470_s25  ;;  %s1478_s24 = smov 24  }
  0xf2   : > { %922 = vrot.lane.b32.xlu1 %v587_v22, %s1471_s26  ;;  %924 = vrot.lane.b32.xlu0 %v1604_v16, %s1471_s26 }
  0xf3   : > { %1330 = vmatmul.mubr.msk.bf16.vlgmr.msra.gmra.mrb[4].mxu0 %vm589_vm2, %v587_v22 }
  0xf4   : > { %1341 = vmatprep.mubr.msk.bf16.mxu0 %vm1468_vm0, %v1467_v1 }
 0x15c   : > { %v703_v23 = vpop.permute.xlu0 %702  ;;  %v814_v25 = vpop.permute.xlu1 %813 }
 0x15d   : > { %v708_v24 = vsel %vm589_vm2, %v703_v23, 0  ;;  %v819_v27 = vsel %vm589_vm2, %v814_v25, 0 }
 0x15e   : > { %1340 = vmatpush3.bf16.xpose.msra.mxu0 %v708_v24 }
 0x15f   : > { %1351 = vmatprep.subr.bf16.mxu0 %v1467_v1 }
 0x160   : > { %v701_v26 = vpop.permute.xlu0 %700  ;;  %v812_v29 = vpop.permute.xlu1 %811 }
 0x164   : > { %v925_v28 = vpop.permute.xlu0 %924  ;;  %v923_v31 = vpop.permute.xlu1 %922 }
 0x165   : > { %1342 = vmatmul.mubr.msk.bf16.vlgmr.msra.gmra.mrb[8].mxu0 %vm589_vm2, %v701_v26  ;;  %v930_v30 = vsel %vm589_vm2, %v925_v28, 0 }
 0x166   : > { %1352 = vmatpush3.bf16.xpose.msra.mxu0 %v819_v27  ;;  %1353 = vmatprep.mubr.msk.bf16.mxu0 %vm1468_vm0, %v1467_v1 }
 0x167   : > { %1363 = vmatprep.subr.bf16.mxu0 %v1467_v1 }
 0x16d   : > { %1354 = vmatmul.mubr.msk.bf16.vlgmr.msra.gmra.mrb[12].mxu0 %vm589_vm2, %v812_v29 }
 0x16e   : > { %1364 = vmatpush3.bf16.xpose.msra.mxu0 %v930_v30  ;;  %1365 = vmatprep.mubr.msk.bf16.mxu0 %vm1468_vm0, %v1467_v1 }
 0x16f   : > { %1375 = vmatprep.subr.bf16.mxu0 %v1467_v1 }
 0x175   : > { %1366 = vmatmul.mubr.msk.bf16.vlgmr.msra.gmra.mrb[16].mxu0 %vm589_vm2, %v923_v31 }
 0x176   : > { %1379 = vmatprep.mubr.msk.bf16.mxu0 %vm1468_vm0, %v1467_v1 }
 0x1c6   : > { %v630_v34 = vpop.f32.mrb[4].mxu0 }
 0x1c7   : > { %v631_v35 = vadd.f32 %v630_v34, %v452_v33  ;;  %v1331_v36 = vpop.f32.mrb[5].mxu0 }
 0x1c8   : > { %v633_v37 = vpop.f32.mrb[6].mxu0 }
 0x1c9   : > { %v1332_v38 = vpop.f32.mrb[7].mxu0  ;;  %v636_v39 = vsel %vm589_vm2, %v631_v35, -inf }
 0x1ca   : > { %637 = vmax.xlane.f32.xlu0 %v636_v39 }
 0x238   : > { %v744_v40 = vpop.f32.mrb[8].mxu0 }
 0x239   : > { %v745_v41 = vadd.f32 %v744_v40, %v452_v33  ;;  %v1343_v42 = vpop.f32.mrb[9].mxu0 }
 0x23a   : > { %v747_v43 = vpop.f32.mrb[10].mxu0 }
 0x23b   : > { %v1344_v44 = vpop.f32.mrb[11].mxu0  ;;  %v750_v45 = vsel %vm589_vm2, %v745_v41, -inf }
 0x23c   : > { %751 = vmax.xlane.f32.xlu1 %v750_v45  ;;  %v1423_v44 = vld [vmem:[%s1704_s7] sm:$0xff]  }
 0x23d   : > { %1376 = vmatpush3.bf16.msra.mxu0 %v1423_v44 }
 0x23e   : > { %1377 = vmatprep.subr.bf16.mxu0 %v1467_v1 }
 0x240   : > { %v855_v46 = vpop.f32.mrb[12].mxu0 }
 0x241   : > { %v856_v47 = vadd.f32 %v855_v46, %v452_v33  ;;  %v1355_v48 = vpop.f32.mrb[13].mxu0  ;;  %v1424_v46 = vld [vmem:[%s1704_s7 + $0x8] sm:$0xff]  }
 0x242   : > { %v858_v49 = vpop.f32.mrb[14].mxu0  ;;  %1378 = vmatpush3.bf16.msra.mxu0 %v1424_v46 }
 0x243   : > { %v1356_v50 = vpop.f32.mrb[15].mxu0  ;;  %v861_v51 = vsel %vm589_vm2, %v856_v47, -inf }
 0x244   : > { %862 = vmax.xlane.f32.xlu0 %v861_v51 }
 0x248   : > { %v966_v52 = vpop.f32.mrb[16].mxu0 }
 0x249   : > { %v967_v53 = vadd.f32 %v966_v52, %v452_v33  ;;  %v1367_v54 = vpop.f32.mrb[17].mxu0 }
 0x24a   : > { %v969_v55 = vpop.f32.mrb[18].mxu0 }
 0x24b   : > { %v1368_v56 = vpop.f32.mrb[19].mxu0  ;;  %v972_v57 = vsel %vm589_vm2, %v967_v53, -inf }
 0x24c   : > { %973 = vmax.xlane.f32.xlu0 %v972_v57 }
 0x257   : > { %v638_v58 = vpop.xlane.xlu0 %637 }
 0x258   : > { %v639_v59 = vsub.f32 %v631_v35, %v638_v58 }
 0x25a   : > { %v640_v60 = vmul.f32 1.442695, %v639_v59 }
 0x25c   : > { %1425 = vpow2.f32 %v640_v60 }
 0x266   : > { %v1426_v61 = vpop.eup %1425 }
 0x267   : > { %v642_v62 = vsel %vm589_vm2, %v1426_v61, 0.0 }
 0x268   : > { %643 = vadd.xlane.f32.xlu1 %v642_v62 }
 0x279   : > { %649 = vrot.lane.b32.xlu1 %v1604_v16, %s1472_s30 }
 0x2c9   : > { %v752_v63 = vpop.xlane.xlu1 %751 }
 0x2ca   : > { %v753_v0 = vsub.f32 %v745_v41, %v752_v63 }
 0x2cc   : > { %v754_v2 = vmul.f32 1.442695, %v753_v0 }
 0x2ce   : > { %1427 = vpow2.f32 %v754_v2 }
 0x2d1   : > { %v863_v3 = vpop.xlane.xlu0 %862 }
 0x2d2   : > { %v864_v4 = vsub.f32 %v856_v47, %v863_v3 }
 0x2d4   : > { %v865_v5 = vmul.f32 1.442695, %v864_v4  ;;  %v1278_v4 = vld [vmem:[%s1705_s8] ss:$0 sm:$0xff] }
 0x2d6   : > { %1429 = vpow2.f32 %v865_v5  ;;  %v1116_v5 = vunpack.c.l.bf16 %v1590_v6 }
 0x2d8   : > { %v1428_v7 = vpop.eup %1427 }
 0x2d9   : > { %v974_v8 = vpop.xlane.xlu0 %973  ;;  %v756_v9 = vsel %vm589_vm2, %v1428_v7, 0.0 }
 0x2da   : > { %v975_v10 = vsub.f32 %v967_v53, %v974_v8  ;;  %757 = vadd.xlane.f32.xlu0 %v756_v9 }
 0x2dc   : > { %v976_v11 = vmul.f32 1.442695, %v975_v10 }
 0x2de   : > { %1431 = vpow2.f32 %v976_v11 }
 0x2e0   : > { %v1430_v12 = vpop.eup %1429 }
 0x2e1   : > { %v867_v13 = vsel %vm589_vm2, %v1430_v12, 0.0 }
 0x2e2   : > { %868 = vadd.xlane.f32.xlu1 %v867_v13 }
 0x2e8   : > { %v1432_v14 = vpop.eup %1431 }
 0x2e9   : > { %v978_v15 = vsel %vm589_vm2, %v1432_v14, 0.0 }
 0x2ea   : > { %979 = vadd.xlane.f32.xlu0 %v978_v15 }
 0x2f3   : > { %873 = vrot.lane.b32.xlu1 %v1604_v16, %s1473_s12 }
 0x2f5   : > { %v644_v17 = vpop.xlane.xlu1 %643 }
 0x2f6   : > { %1433 = vrcp.f32 %v644_v17 }
 0x2f7   : > { %984 = vrot.lane.b32.xlu1 %v1604_v16, %s1474_s13 }
 0x2f9   : > { %v650_v18 = vpop.permute.xlu1 %649 }
 0x2fa   : > { %v656_v19 = vsel %vm654_vm4, %v650_v18, 0 }
 0x2fb   : > { %1334 = vmatpush3.bf16.msra.mxu1 %v656_v19 }
 0x2fc   : > { %1345 = vmatprep.subr.bf16.mxu1 %v1467_v1 }
 0x300   : > { %v1434_v20 = vpop.eup %1433  ;;  %762 = vrot.lane.b32.xlu0 %v1604_v16, %s1475_s14 }
 0x301   : > { %v646_v21 = vmul.f32 %v1434_v20, %v1426_v61 }
 0x303   : > { %v647_v22 = vpack.c.bf16 %v646_v21, %v646_v21 }
 0x305   : > { %1336 = vmatmul.mubr.msk.bf16.vlgmr.msra.gmra.mrb[4].mxu1 %vm589_vm2, %v647_v22 }
 0x306   : > { %1347 = vmatprep.mubr.msk.bf16.mxu1 %vm1468_vm0, %v1467_v1 }
 0x367   : > { %v758_v23 = vpop.xlane.xlu0 %757 }
 0x368   : > { %1435 = vrcp.f32 %v758_v23  ;;  %v1282_v23 = vld [vmem:[%s1706_s9] ss:$0 sm:$0xff] }
 0x36f   : > { %v869_v24 = vpop.xlane.xlu1 %868 }
 0x370   : > { %1437 = vrcp.f32 %v869_v24 }
 0x372   : > { %v1436_v25 = vpop.eup %1435 }
 0x373   : > { %v760_v27 = vmul.f32 %v1436_v25, %v1428_v7  ;;  %v874_v30 = vpop.permute.xlu1 %873  ;;  %v1283_v25 = vld [vmem:[%s1707_s10] ss:$0 sm:$0xff] }
 0x374   : > { %v879_v32 = vsel %vm654_vm4, %v874_v30, 0 }
 0x375   : > { %v761_v16 = vpack.c.bf16 %v760_v27, %v760_v27 }
 0x377   : > { %v980_v26 = vpop.xlane.xlu0 %979  ;;  %v985_v34 = vpop.permute.xlu1 %984 }
 0x378   : > { %1439 = vrcp.f32 %v980_v26  ;;  %v990_v37 = vsel %vm654_vm4, %v985_v34, 0 }
 0x37a   : > { %v1438_v31 = vpop.eup %1437 }
 0x37b   : > { %v763_v28 = vpop.permute.xlu0 %762  ;;  %v871_v33 = vmul.f32 %v1438_v31, %v1430_v12 }
 0x37c   : > { %v768_v29 = vsel %vm654_vm4, %v763_v28, 0 }
 0x37d   : > { %1346 = vmatpush3.bf16.msra.mxu1 %v768_v29  ;;  %v872_v35 = vpack.c.bf16 %v871_v33, %v871_v33 }
 0x37e   : > { %1357 = vmatprep.subr.bf16.mxu1 %v1467_v1 }
 0x380   : > { %1348 = vmatmul.mubr.msk.bf16.vlgmr.msra.gmra.mrb[8].mxu1 %vm589_vm2, %v761_v16 }
 0x381   : > { %1358 = vmatpush3.bf16.msra.mxu1 %v879_v32  ;;  %1359 = vmatprep.mubr.msk.bf16.mxu1 %vm1468_vm0, %v1467_v1 }
 0x382   : > { %1369 = vmatprep.subr.bf16.mxu1 %v1467_v1  ;;  %v1440_v36 = vpop.eup %1439 }
 0x383   : > { %v982_v38 = vmul.f32 %v1440_v36, %v1432_v14 }
 0x385   : > { %v983_v39 = vpack.c.bf16 %v982_v38, %v982_v38 }
 0x388   : > { %1360 = vmatmul.mubr.msk.bf16.vlgmr.msra.gmra.mrb[12].mxu1 %vm589_vm2, %v872_v35 }
 0x389   : > { %1370 = vmatpush3.bf16.msra.mxu1 %v990_v37  ;;  %1371 = vmatprep.mubr.msk.bf16.mxu1 %vm1468_vm0, %v1467_v1 }
 0x390   : > { %1372 = vmatmul.mubr.msk.bf16.vlgmr.msra.gmra.mrb[16].mxu1 %vm589_vm2, %v983_v39 }
 0x3d8   : > { %v692_v40 = vpop.f32.mrb[4].mxu1 }
 0x3d9   : > { %v1337_v41 = vpop.f32.mrb[5].mxu1  ;;  %v698_v61 = vpack.c.bf16 %v692_v40, %v692_v40 }
 0x3da   : > { %v695_v42 = vpop.f32.mrb[6].mxu1 }
 0x3db   : > { %v1338_v43 = vpop.f32.mrb[7].mxu1 }
 0x453   : > { %v804_v45 = vpop.f32.mrb[8].mxu1 }
 0x454   : > { %v810_v47 = vpack.c.bf16 %v804_v45, %v804_v45  ;;  %v1349_v48 = vpop.f32.mrb[9].mxu1 }
 0x455   : > { %v807_v49 = vpop.f32.mrb[10].mxu1 }
 0x456   : > { %1034 = vrot.lane.b32.xlu0 %v810_v47, %s1476_s22  ;;  %v1350_v50 = vpop.f32.mrb[11].mxu1 }
 0x45b   : > { %v915_v51 = vpop.f32.mrb[12].mxu1 }
 0x45c   : > { %v921_v52 = vpack.c.bf16 %v915_v51, %v915_v51  ;;  %v1361_v53 = vpop.f32.mrb[13].mxu1 }
 0x45d   : > { %v918_v54 = vpop.f32.mrb[14].mxu1 }
 0x45e   : > { %1037 = vrot.lane.b32.xlu1 %v921_v52, %s1477_s23  ;;  %v1362_v55 = vpop.f32.mrb[15].mxu1 }
 0x463   : > { %v1026_v56 = vpop.f32.mrb[16].mxu1 }
 0x464   : > { %v1032_v57 = vpack.c.bf16 %v1026_v56, %v1026_v56  ;;  %v1373_v58 = vpop.f32.mrb[17].mxu1 }
 0x465   : > { %v1029_v59 = vpop.f32.mrb[18].mxu1 }
 0x466   : > { %1040 = vrot.lane.b32.xlu0 %v1032_v57, %s1478_s24  ;;  %v1374_v60 = vpop.f32.mrb[19].mxu1 }
 0x4c8   : > { %v1035_v1 = vpop.permute.xlu0 %1034 }
 0x4c9   : > { %v1044_v63 = vsel %vm589_vm2, %v698_v61, %v1035_v1 }
 0x4d0   : > { %v1038_v62 = vpop.permute.xlu1 %1037 }
 0x4d1   : > { %v1047_v0 = vsel %vm1045_vm5, %v1044_v63, %v1038_v62 }
 0x4d8   : > { %v1041_v2 = vpop.permute.xlu0 %1040 }
 0x4d9   : > { %v1050_v3 = vsel %vm1048_vm6, %v1047_v0, %v1041_v2 }
 0x4da   : > { %1380 = vmatmul.mubr.msk.bf16.vlgmr.msra.gmra.mrb[20].mxu0 %vm476_vm1, %v1050_v3 }
 0x5ad   : > { %v1110_v7 = vpop.f32.mrb[20].mxu0 }
 0x5ae   : > { %v1111_v8 = vadd.f32 %v1278_v4, %v1110_v7  ;;  %v1381_v9 = vpop.f32.mrb[21].mxu0 }
 0x5af   : > { %v1113_v10 = vpop.f32.mrb[22].mxu0 }
 0x5b0   : > { %v1382_v11 = vpop.f32.mrb[23].mxu0  ;;  %v1117_v12 = vadd.f32 %v1116_v5, %v1111_v8 }
 0x5b2   : > { %v1118_v13 = vsel %vm476_vm1, %v1117_v12, 0.0 }
 0x5b3   : > { %1119 = vadd.xlane.f32.xlu1 %v1118_v13 }
 0x640   : > { %v1120_v14 = vpop.xlane.xlu1 %1119 }
 0x641   : > { %v1122_v15 = vmul.f32 0.03125, %v1120_v14 }
 0x643   : > { %v1123_v17 = vsub.f32 %v1117_v12, %v1122_v15 }
 0x645   : > { %v1124_v18 = vmul.f32 %v1123_v17, %v1123_v17 }
 0x647   : > { %v1125_v19 = vsel %vm476_vm1, %v1124_v18, 0.0 }
 0x648   : > { %1126 = vadd.xlane.f32.xlu0 %v1125_v19 }
 0x6d5   : > { %v1127_v20 = vpop.xlane.xlu0 %1126 }
 0x6d6   : > { %v1128_v21 = vmul.f32 0.03125, %v1127_v20 }
 0x6d8   : > { %v1129_v6 = vadd.f32 1e-05, %v1128_v21 }
 0x6da   : > { %1441 = vrsqrt.f32 %v1129_v6 }
 0x6e4   : > { %v1442_v22 = vpop.eup %1441 }
 0x6e5   : > { %v1131_v24 = vmul.f32 %v1442_v22, %v1123_v17 }
 0x6e7   : > { %v1139_v26 = vmul.f32 %v1282_v23, %v1131_v24 }
 0x6e9   : > { %v1147_v27 = vadd.f32 %v1283_v25, %v1139_v26 }
 0x6eb   : > { %v1148_v28 = vpack.c.bf16 %v1147_v27, %v1147_v27 }
 0x6ed   : > { %1150 = vst.msk [vmem:[%s446_s15] sm:$0xf] %vm1149_vm7, %v1148_v28 }
 0x6ee PF: > { %s21_s19 = sadd.s32 1, %s1465_s19   ;;  %s1709_s17 = smov %s1461_s18 }
 0x6ef   : > { %p18_p5 = scmp.ge.s32.totalorder %s21_s19, 4   ;;  %s1710_s18 = smov %s1712_s20 }
 0x6f1   :  { %20 = sbr.rel (!%p18_p5) target bundleno = 2 (0x2), region = 100 }

</bundles_post_ra>
